<compile_context>
chip_gen: v7x
topology: tpu7x:2x2x1
jax: 0.10.0
libtpu: 0.0.40
codegen_flags: <defaults>
</compile_context>

<pallas_src>
import functools

import numpy as np
import jax
import jax.numpy as jnp
from jax.experimental import pallas as pl
from jax.experimental.pallas import tpu as pltpu


def _round_up(x, m):
    return ((x + m - 1) // m) * m


# ----------------------------------------------------------------------------
# Gaussian kernels (FOMM AntiAliasInterpolation2d)
# ----------------------------------------------------------------------------
def _make_gaussian_1d(scale):
    sigma = (1.0 / scale - 1.0) / 2.0
    ksize = 2 * int(round(sigma * 4)) + 1
    ax = np.arange(ksize, dtype=np.float64)
    mean = (ksize - 1) / 2.0
    g = np.exp(-((ax - mean) ** 2) / (2.0 * sigma ** 2))
    return (g / g.sum()).astype(np.float32)


def _make_gaussian_np(scale):
    g1 = _make_gaussian_1d(scale).astype(np.float64)
    k = np.outer(g1, g1)
    return (k / k.sum()).astype(np.float32)


# ----------------------------------------------------------------------------
# Pallas kernels
# ----------------------------------------------------------------------------
def _pyramid_kernel(n_slabs, x_ref, dv_ref, dh_ref, o_ref):
    """Blur + stride-`step` nearest subsample as out_s = Dv @ x_s @ Dh per slab (MXU)."""
    dv = dv_ref[...]                                     # (Hd, Hp) f32
    dh = dh_ref[...]                                     # (Wp, Wd) f32
    for s in range(n_slabs):
        vb = jnp.dot(dv, x_ref[s], preferred_element_type=jnp.float32)     # (Hd, Wp)
        o_ref[s] = jnp.dot(vb, dh, preferred_element_type=jnp.float32)     # (Hd, Wd)


def _matmul_bias_lrelu_kernel(negative_slope, x_ref, w_ref, b_ref, o_ref):
    """Fused (patches @ weight) + bias + leaky relu.  Used for the Cin=3 first conv (bf16 MXU)."""
    y = jnp.dot(x_ref[...], w_ref[...], preferred_element_type=jnp.float32) + b_ref[...]
    y = jnp.where(y >= 0, y, negative_slope * y)
    o_ref[...] = y.astype(o_ref.dtype)


def _disc_tail_kernel(K, Hp, Wp, Ho, Wo, negative_slope, n_real, gan_loss, inv_count,
                      h0_ref, pw_ref, w1_ref, b1_ref, wf_ref, bf_ref, o_ref, flat_ref):
    """Fused (2x2 avg-pool) -> (4x4 VALID conv + bias + leaky-relu) -> (1x1 pred conv) -> GAN loss.

    h0_ref : (H0, W0, C) bf16, one image of the first-conv activation (C=64, un-padded).
    pw_ref : (Wp, W0) f32 horizontal pooling matrix (0.5 at the two source columns of each pool).
    flat_ref (scratch): (K, Hp*Wo, C) bf16; flat_ref[kw, a*Wo + c] = pooled[a, kw + c] so every
                        conv1 tap's lhs is one contiguous (Ho*Wo, C) slice -> one MXU dot per tap.
    o_ref  : (1, 1) per-image loss contribution (already divided by n_real * Ho * Wo).
    """
    n = pl.program_id(0)
    pw = pw_ref[...]

    # fused 2x2 avg-pool (floor): vertical pair add (VPU, f32) + horizontal pooling matmul (MXU).
    for a in range(Hp):
        v = (h0_ref[2 * a].astype(jnp.float32) + h0_ref[2 * a + 1].astype(jnp.float32)) * 0.5
        r = jnp.dot(pw, v, preferred_element_type=jnp.float32)            # (Wp, C)
        rb = r.astype(jnp.bfloat16)
        for kw in range(K):
            flat_ref[kw, a * Wo:(a + 1) * Wo, :] = rb[kw:kw + Wo, :]

    # conv1: K*K taps, each ONE batched (Ho*Wo, C) @ (C, Cout) MXU dot, accumulated in f32.
    cout = w1_ref.shape[-1]
    acc = jnp.zeros((Ho * Wo, cout), jnp.float32)
    for kh in range(K):
        for kw in range(K):
            acc = acc + jnp.dot(flat_ref[kw, kh * Wo:(kh + Ho) * Wo, :],
                                w1_ref[kh * K + kw],
                                preferred_element_type=jnp.float32)
    y = acc + b1_ref[...]
    y = jnp.where(y >= 0, y, negative_slope * y)

    # fused 1x1 prediction conv (Cout=1) + hinge/ls GAN loss; pred map never stored to HBM.
    pred = jnp.sum(y * wf_ref[...], axis=-1, keepdims=True) + bf_ref[...]  # (Ho*Wo, 1)
    if gan_loss == "hinge":
        r_term = jnp.maximum(1.0 - pred, 0.0)
        g_term = jnp.maximum(1.0 + pred, 0.0)
    else:  # 'ls'
        r_term = (1.0 - pred) ** 2
        g_term = pred ** 2
    term = jnp.where(n < n_real, r_term, g_term)       # batch = [real..., gen...]
    o_ref[...] = jnp.sum(term) * inv_count + jnp.zeros((1, 1), jnp.float32)


# ----------------------------------------------------------------------------
# Pallas wrappers
# ----------------------------------------------------------------------------
def pyramid_scale_pallas(x_nchw, scale):
    """AntiAliasInterpolation2d: identity at scale 1, else fused blur + nearest subsample.

    Input is NCHW (PyTorch layout); output is NHWC for the convs."""
    B, C, H, W = x_nchw.shape
    if scale == 1:
        return jnp.transpose(x_nchw, (0, 2, 3, 1)).astype(jnp.float32)

    g = _make_gaussian_1d(scale)
    K = int(g.shape[0])
    ka = K // 2
    step = int(round(1.0 / scale))
    Hd, Wd = -(-H // step), -(-W // step)
    BC = B * C

    # glue: NCHW -> (B*C, H, W) is a free view; one zero pad (F.pad equivalent).
    xp = jnp.pad(x_nchw.reshape(BC, H, W), ((0, 0), (ka, ka), (ka, ka)))
    Hp, Wp = H + 2 * ka, W + 2 * ka

    # separable blur + subsample as two small matrices (host-built constants).
    dv = np.zeros((Hd, Hp), np.float32)
    for i in range(Hd):
        dv[i, step * i:step * i + K] = g
    dh = np.zeros((Wp, Wd), np.float32)
    for j in range(Wd):
        dh[step * j:step * j + K, j] = g

    n_blk = 2 if BC % 2 == 0 else 1        # keep >=2 parallel steps for v7x megacore
    s_blk = BC // n_blk
    out = pl.pallas_call(
        functools.partial(_pyramid_kernel, s_blk),
        out_shape=jax.ShapeDtypeStruct((BC, Hd, Wd), jnp.float32),
        grid=(n_blk,),
        in_specs=[
            pl.BlockSpec((s_blk, Hp, Wp), lambda i: (i, 0, 0)),
            pl.BlockSpec((Hd, Hp), lambda i: (0, 0)),
            pl.BlockSpec((Wp, Wd), lambda i: (0, 0)),
        ],
        out_specs=pl.BlockSpec((s_blk, Hd, Wd), lambda i: (i, 0, 0)),
        compiler_params=pltpu.CompilerParams(dimension_semantics=("parallel",)),
    )(xp, jnp.asarray(dv), jnp.asarray(dh))
    return jnp.transpose(out.reshape(B, C, Hd, Wd), (0, 2, 3, 1))


def _im2col_nhwc(x, K):
    """Glue: extract KxK VALID patches, channels-last (matches HWIO weight reshape)."""
    N, H, W, C = x.shape
    Ho, Wo = H - K + 1, W - K + 1
    cols = []
    for kh in range(K):
        for kw in range(K):
            cols.append(x[:, kh:kh + Ho, kw:kw + Wo, :])
    p = jnp.concatenate(cols, axis=-1)
    return p.reshape(N * Ho * Wo, K * K * C), (N, Ho, Wo)


def conv0_im2col_pallas(x, w, b, *, negative_slope=0.2):
    """First conv (Cin=3): bf16 im2col + ONE fused matmul+bias+lrelu split into 2 big tiles.
    Output is un-padded C=64, bf16 (halves h0 HBM writeback vs padded f32)."""
    N, H, W, Cin = x.shape
    K, Cout = int(w.shape[0]), int(w.shape[-1])
    patches, (N_, Ho, Wo) = _im2col_nhwc(x.astype(jnp.bfloat16), K)
    M, Kd = patches.shape
    n_blk = 2 if M >= 16 else 1            # 2 parallel tiles (v7x megacore); pure overhead either way
    tile_m = _round_up(-(-M // n_blk), 8)
    Mp = tile_m * n_blk
    patches = jnp.pad(patches, ((0, Mp - M), (0, 0)))
    wm = w.reshape(K * K * Cin, Cout).astype(jnp.bfloat16)
    bm = b.reshape(1, Cout).astype(jnp.float32)
    out = pl.pallas_call(
        functools.partial(_matmul_bias_lrelu_kernel, negative_slope),
        out_shape=jax.ShapeDtypeStruct((Mp, Cout), jnp.bfloat16),
        grid=(n_blk,),
        in_specs=[
            pl.BlockSpec((tile_m, Kd), lambda i: (i, 0)),
            pl.BlockSpec((Kd, Cout), lambda i: (0, 0)),
            pl.BlockSpec((1, Cout), lambda i: (0, 0)),
        ],
        out_specs=pl.BlockSpec((tile_m, Cout), lambda i: (i, 0)),
        compiler_params=pltpu.CompilerParams(dimension_semantics=("parallel",)),
    )(patches, wm, bm)
    return out[:M].reshape(N_, Ho, Wo, Cout)


def disc_tail_pallas(h0, w1, b1, wf, bf, *, n_real, gan_loss, negative_slope=0.2):
    """Fused pool + conv1 + 1x1 pred + GAN loss.  h0 batch = [real_0..real_{n-1}, gen_0..gen_{n-1}].
    Returns per-image loss contributions of shape (B, 1, 1); their sum is the per-scale value."""
    B, H0, W0, Cin = h0.shape
    K, Cout = int(w1.shape[0]), int(w1.shape[-1])
    Hp, Wp = H0 // 2, W0 // 2
    Ho, Wo = Hp - K + 1, Wp - K + 1
    assert Ho >= 1 and Wo >= 1, "input too small for the synthetic discriminator"
    inv_count = 1.0 / float(n_real * Ho * Wo)

    # horizontal 2x2-pool matrix (handles odd trailing column: its weight is simply never used).
    pwm = np.zeros((Wp, W0), np.float32)
    for bb in range(Wp):
        pwm[bb, 2 * bb] = 0.5
        pwm[bb, 2 * bb + 1] = 0.5

    w1r = w1.reshape(K * K, Cin, Cout).astype(jnp.bfloat16)
    b1r = b1.reshape(1, Cout).astype(jnp.float32)
    wfr = wf.reshape(1, Cout).astype(jnp.float32)
    bfr = bf.reshape(1, 1).astype(jnp.float32)

    out = pl.pallas_call(
        functools.partial(_disc_tail_kernel, K, Hp, Wp, Ho, Wo, negative_slope,
                          n_real, gan_loss, inv_count),
        out_shape=jax.ShapeDtypeStruct((B, 1, 1), jnp.float32),
        grid=(B,),
        in_specs=[
            pl.BlockSpec((None, H0, W0, Cin), lambda n: (n, 0, 0, 0)),
            pl.BlockSpec((Wp, W0), lambda n: (0, 0)),
            pl.BlockSpec((K * K, Cin, Cout), lambda n: (0, 0, 0)),
            pl.BlockSpec((1, Cout), lambda n: (0, 0)),
            pl.BlockSpec((1, Cout), lambda n: (0, 0)),
            pl.BlockSpec((1, 1), lambda n: (0, 0)),
        ],
        out_specs=pl.BlockSpec((None, 1, 1), lambda n: (n, 0, 0)),
        scratch_shapes=[pltpu.VMEM((K, Hp * Wo, Cin), jnp.bfloat16)],
        compiler_params=pltpu.CompilerParams(dimension_semantics=("parallel",)),
    )(h0, jnp.asarray(pwm), w1r, b1r, wfr, bfr)
    return out


# ----------------------------------------------------------------------------
# Synthetic discriminator params + full model forward
# ----------------------------------------------------------------------------
def init_disc_params(key, img_channels):
    ks = jax.random.split(key, 6)
    return {
        "w0": 0.05 * jax.random.normal(ks[0], (4, 4, img_channels, 64), jnp.float32),
        "b0": 0.05 * jax.random.normal(ks[1], (64,), jnp.float32),
        "w1": 0.05 * jax.random.normal(ks[2], (4, 4, 64, 64), jnp.float32),
        "b1": 0.05 * jax.random.normal(ks[3], (64,), jnp.float32),
        "wf": 0.05 * jax.random.normal(ks[4], (1, 1, 64, 1), jnp.float32),
        "bf": 0.05 * jax.random.normal(ks[5], (1,), jnp.float32),
    }


def discriminator_full_model_forward(x, generated, params, *, scales, disc_weight, gan_loss="hinge"):
    """Pallas implementation of DiscriminatorFullModel.forward.  Inputs are NCHW (PyTorch layout)."""
    # TODO(synk): requires_grad(generator/discriminator, ...) has no forward-pass equivalent in JAX.
    if gan_loss not in ("hinge", "ls"):
        raise NotImplementedError("Unexpected gan_loss {}".format(gan_loss))
    prediction = jax.lax.stop_gradient(generated["prediction"])   # .detach()
    real = x["dri_img"]
    n_real = real.shape[0]
    # real & generated branches share discriminator weights -> run them as one batch [real, gen].
    combined = jnp.concatenate([real, prediction], axis=0)

    loss_values = {}
    value_total = jnp.float32(0.0)
    for s in scales:
        xs = pyramid_scale_pallas(combined, s)                                   # NHWC f32
        p = params[s]
        h0 = conv0_im2col_pallas(xs, p["w0"], p["b0"], negative_slope=0.2)       # (B,Ho,Wo,64) bf16
        per_img = disc_tail_pallas(h0, p["w1"], p["b1"], p["wf"], p["bf"],
                                   n_real=n_real, gan_loss=gan_loss)             # (B,1,1)
        value_total = value_total + disc_weight * jnp.sum(per_img)
    loss_values["discriminator"] = value_total
    return loss_values


# ----------------------------------------------------------------------------
# Pure-JAX reference (numerical sanity check, f32 HIGHEST precision)
# ----------------------------------------------------------------------------
def _ref_conv(x, w, b, *, negative_slope=None, pool=False):
    y = jax.lax.conv_general_dilated(
        x, w, (1, 1), "VALID", dimension_numbers=("NHWC", "HWIO", "NHWC"),
        precision=jax.lax.Precision.HIGHEST) + b
    if negative_slope is not None:
        y = jnp.where(y >= 0, y, negative_slope * y)
    if pool:
        N, H, W, C = y.shape
        y = y[:, : H // 2 * 2, : W // 2 * 2, :].reshape(N, H // 2, 2, W // 2, 2, C).mean(axis=(2, 4))
    return y


def _ref_pyramid(x_nhwc, scale):
    if scale == 1:
        return x_nhwc
    gauss = jnp.asarray(_make_gaussian_np(scale))
    C = x_nhwc.shape[-1]
    K = gauss.shape[0]
    ka = K // 2
    xp = jnp.pad(x_nhwc, ((0, 0), (ka, ka), (ka, ka), (0, 0)))
    w = jnp.broadcast_to(gauss[:, :, None, None], (K, K, 1, C))
    y = jax.lax.conv_general_dilated(
        xp, w, (1, 1), "VALID", dimension_numbers=("NHWC", "HWIO", "NHWC"),
        feature_group_count=C, precision=jax.lax.Precision.HIGHEST)
    step = int(round(1.0 / scale))
    return y[:, ::step, ::step, :]


def _ref_forward(x, generated, params, *, scales, disc_weight, gan_loss="hinge"):
    xr = jnp.transpose(x["dri_img"], (0, 2, 3, 1))
    xg = jnp.transpose(generated["prediction"], (0, 2, 3, 1))
    total = jnp.float32(0.0)
    for s in scales:
        pr_in, pg_in = _ref_pyramid(xr, s), _ref_pyramid(xg, s)
        p = params[s]

        def disc(z, p=p):
            h = _ref_conv(z, p["w0"], p["b0"], negative_slope=0.2, pool=True)
            h = _ref_conv(h, p["w1"], p["b1"], negative_slope=0.2, pool=False)
            return _ref_conv(h, p["wf"], p["bf"])

        pr, pg = disc(pr_in), disc(pg_in)
        if gan_loss == "hinge":
            v = jnp.mean(jnp.maximum(1.0 - pr, 0.0)) + jnp.mean(jnp.maximum(1.0 + pg, 0.0))
        else:
            v = jnp.mean((1.0 - pr) ** 2 + pg ** 2)
        total = total + disc_weight * v
    return total


# ----------------------------------------------------------------------------
if __name__ == "__main__":
    N, C, H, W = 2, 3, 32, 32
    key = jax.random.PRNGKey(0)
    k1, k2 = jax.random.split(key)
    x = {"dri_img": jax.random.normal(k1, (N, C, H, W), jnp.float32)}          # NCHW (PyTorch)
    generated = {"prediction": jax.random.normal(k2, (N, C, H, W), jnp.float32)}

    scales = (1, 0.5)                      # train_params.scales == discriminator.scales
    disc_weight = 1.0                      # train_params.loss_weights.discriminator
    pkeys = jax.random.split(jax.random.PRNGKey(42), len(scales))
    params = {s: init_disc_params(k, C) for s, k in zip(scales, pkeys)}

    loss_values = discriminator_full_model_forward(
        x, generated, params, scales=scales, disc_weight=disc_weight, gan_loss="hinge")
    val = jax.block_until_ready(loss_values["discriminator"])

    ref = float(jax.block_until_ready(
        _ref_forward(x, generated, params, scales=scales, disc_weight=disc_weight, gan_loss="hinge")))
    got = float(val)
    assert abs(got - ref) <= 3e-3 + 2e-2 * abs(ref), (got, ref)

    print("KERNEL_OK")
</pallas_src>

<mosaic_0001>
module attributes {stable_mosaic.version = 11 : i64} {
  func.func @_matmul_bias_lrelu_kernel(%arg0: i32, %arg1: memref<1688x48xbf16, #tpu.memory_space<vmem>>, %arg2: memref<48x64xbf16, #tpu.memory_space<vmem>>, %arg3: memref<1x64xf32, #tpu.memory_space<vmem>>, %arg4: memref<1688x64xbf16, #tpu.memory_space<vmem>>) attributes {dimension_semantics = [#tpu.dimension_semantics<parallel>], iteration_bounds = array<i64: 2>, scalar_prefetch = 0 : i64, scratch_operands = 0 : i64, tpu.core_type = #tpu.core_type<tc>, window_params = [{transform_indices = @transform_0, window_bounds = array<i64: 1688, 48>}, {pipeline_mode = #tpu.pipeline_mode<synchronous>, transform_indices = @transform_1, window_bounds = array<i64: 48, 64>}, {pipeline_mode = #tpu.pipeline_mode<synchronous>, transform_indices = @transform_2, window_bounds = array<i64: 1, 64>}, {transform_indices = @transform_3, window_bounds = array<i64: 1688, 64>}]} {
    %c0 = arith.constant 0 : index
    %c0_0 = arith.constant 0 : index
    %0 = vector.load %arg1[%c0, %c0_0] : memref<1688x48xbf16, #tpu.memory_space<vmem>>, vector<1688x48xbf16>
    %c0_1 = arith.constant 0 : index
    %c0_2 = arith.constant 0 : index
    %1 = vector.load %arg2[%c0_1, %c0_2] : memref<48x64xbf16, #tpu.memory_space<vmem>>, vector<48x64xbf16>
    %cst = arith.constant dense<0.000000e+00> : vector<1688x64xf32>
    %2 = tpu.matmul %0, %1, %cst {dimension_numbers = #tpu.dot_dimension_numbers<[1], [0], [0], [1], [0, 0, 1, 1], [], []>} : vector<1688x48xbf16>, vector<48x64xbf16>, vector<1688x64xf32> -> vector<1688x64xf32>
    %c0_3 = arith.constant 0 : index
    %c0_4 = arith.constant 0 : index
    %3 = vector.load %arg3[%c0_3, %c0_4] : memref<1x64xf32, #tpu.memory_space<vmem>>, vector<1x64xf32>
    %4 = vector.broadcast %3 : vector<1x64xf32> to vector<1688x64xf32>
    %5 = arith.addf %2, %4 : vector<1688x64xf32>
    %cst_5 = arith.constant 0.000000e+00 : f32
    %6 = vector.broadcast %cst_5 : f32 to vector<1688x64xf32>
    %7 = arith.cmpf oge, %5, %6 : vector<1688x64xf32>
    %cst_6 = arith.constant 2.000000e-01 : f32
    %8 = vector.broadcast %cst_6 : f32 to vector<1688x64xf32>
    %9 = arith.mulf %8, %5 : vector<1688x64xf32>
    %10 = arith.select %7, %5, %9 : vector<1688x64xi1>, vector<1688x64xf32>
    %11 = arith.truncf %10 : vector<1688x64xf32> to vector<1688x64xbf16>
    %c0_7 = arith.constant 0 : index
    %c0_8 = arith.constant 0 : index
    %12 = vector.load %arg4[%c0_7, %c0_8] : memref<1688x64xbf16, #tpu.memory_space<vmem>>, vector<1688x64xbf16>
    tpu.vector_store %arg4[%c0_7, %c0_8], %11 {strides = array<i32>} : memref<1688x64xbf16, #tpu.memory_space<vmem>>, vector<1688x64xbf16>,
    return
  }
  func.func @transform_0(%arg0: i32) -> (i32, i32) {
    %c0_i32 = arith.constant 0 : i32
    %c0_i32_0 = arith.constant 0 : i32
    return %arg0, %c0_i32 : i32, i32
  }
  func.func @transform_1(%arg0: i32) -> (i32, i32) {
    %c0_i32 = arith.constant 0 : i32
    %c0_i32_0 = arith.constant 0 : i32
    %c0_i32_1 = arith.constant 0 : i32
    return %c0_i32, %c0_i32_0 : i32, i32
  }
  func.func @transform_2(%arg0: i32) -> (i32, i32) {
    %c0_i32 = arith.constant 0 : i32
    %c0_i32_0 = arith.constant 0 : i32
    %c0_i32_1 = arith.constant 0 : i32
    return %c0_i32, %c0_i32_0 : i32, i32
  }
  func.func @transform_3(%arg0: i32) -> (i32, i32) {
    %c0_i32 = arith.constant 0 : i32
    %c0_i32_0 = arith.constant 0 : i32
    return %arg0, %c0_i32 : i32, i32
  }
}

</mosaic_0001>

<bundles_post_ra>
// kernel: tpu_custom_call.1
= control target key start
LH: loop header
LB: loop body
LE: loop exit
PB: predicated region body
PF: predicated region fallthrough
CT: control target
= control target key end

     0   :  { %s5017_s12 = smov 0   ;;  %s6436_s0 = inlined_call_operand.vmem [shape: bf16[3376,48], index: 0, kind: input, shape index: {}]   ;;  %s6437_s1 = inlined_call_operand.vmem [shape: bf16[48,64], index: 1, kind: input, shape index: {}]   ;;  %s6438_s2 = inlined_call_operand.vmem [shape: f32[1,64], index: 2, kind: input, shape index: {}]   ;;  %s6439_s3 = inlined_call_operand.vmem [shape: bf16[3376,64], index: 3, kind: output, shape index: {}]  }
   0x1 LB: > { %s3890_s13 = sadd.s32 4294967295, %s4995_s12   ;;  %p3894_p0 = scmp.ge.s32.totalorder %s4995_s12, 1  ;;  %s4995_s12 = sphi %s5017_s12, %s13_s12  }
   0x2   : > { %p138_p1 = scmp.lt.s32.totalorder %s4995_s12, 3 }
   0x4   : > { %p139_p2 = pnand %p3894_p0, %p138_p1 }
   0x5   : > { %v4878_v0 = vld [vmem:[%s6437_s1] sm:$0xff] (!%p139_p2)   ;;  %s162_s16 = smul.u32 (!%p139_p2), 211, %s3890_s13  ;;  %v4879_v1 = vld [vmem:[%s6437_s1 + $0x8] sm:$0xff] (!%p139_p2)   ;;  %v4880_v2 = vld [vmem:[%s6437_s1 + $0x10] sm:$0xff] (!%p139_p2)   ;;  %vm945_vm0 = vcmask (!%p139_p2), 392192   ;;  %vm3622_vm1 = vcmask (!%p139_p2), 519168  }
   0x6   : > { %142 = sbr.rel (%p139_p2) target bundleno = 500 (0x1f4), region = 32  ;;  %4646 = vmatprep.subr.bf16.mxu0 (!%p139_p2), %v4878_v0  ;;  %4864 = vmatprep.subr.bf16.mxu1 (!%p139_p2), %v4878_v0 }
   0x7   : > { %p163_p3 = scmp.lt.s32.totalorder (!%p139_p2), %s162_s16, 421  ;;  %4647 = vmatpush3.bf16.msra.mxu0 (!%p139_p2), %v4878_v0  ;;  %4867 = vmatpush3.bf16.msra.mxu1 (!%p139_p2), %v4878_v0 }
   0x8   : > { %4648 = vmatprep.subr.bf16.mxu0 (!%p139_p2), %v4879_v1  ;;  %4865 = vmatprep.subr.bf16.mxu1 (!%p139_p2), %v4879_v1 }
   0xb   : > { %4649 = vmatpush3.bf16.msra.mxu0 (!%p139_p2), %v4879_v1  ;;  %4868 = vmatpush3.bf16.msra.mxu1 (!%p139_p2), %v4879_v1 }
   0xc   : > { %4650 = vmatprep.subr.bf16.mxu0 (!%p139_p2), %v4880_v2  ;;  %4866 = vmatprep.subr.bf16.mxu1 (!%p139_p2), %v4880_v2 }
   0xd   : > { %s6441_s16 = smov (!%p163_p3, %s162_s16), 421 }
   0xe   : > { %s3895_s21 = sshll.u32 %s6441_s16, 2 }
   0xf   : > { %s5042_s24 = scalar_lea.vmem %s6436_s0, %s3895_s21  ;;  %4651 = vmatpush3.bf16.msra.mxu0 %v4880_v2  ;;  %4869 = vmatpush3.bf16.msra.mxu1 %v4880_v2  ;;  %s5272_s29 = scalar_lea.vmem %s6439_s3, %s3895_s21 }
  0x10   : > { %v4881_v3 = vld [vmem:[%s5042_s24] sm:$0xff]   ;;  %v4882_v4 = vld [vmem:[%s5042_s24 + $0x8] sm:$0xff]   ;;  %v4883_v5 = vld [vmem:[%s5042_s24 + $0x1b0] sm:$0xff]  }
  0x11   : > { %4652 = vmatprep.mubr.msk.bf16.mxu0 %vm945_vm0, %v4881_v3  ;;  %v4884_v6 = vld [vmem:[%s5042_s24 + $0x1b8] sm:$0xff]   ;;  %4760 = vmatprep.mubr.msk.bf16.mxu1 %vm945_vm0, %v4883_v5  ;;  %v4885_v7 = vld [vmem:[%s5042_s24 + $0x10] sm:$0xff]   ;;  %v4887_v8 = vld [vmem:[%s5042_s24 + $0x1c0] sm:$0xff]  }
  0x12   : > { %4653 = vmatmul.mubr.msk.bf16.vlgmr.msra.gmra.mrb[0].mxu0 %vm945_vm0, %v4882_v4  ;;  %4761 = vmatmul.mubr.msk.bf16.vlgmr.msra.gmra.mrb[0].mxu1 %vm945_vm0, %v4884_v6  ;;  %v4886_v9 = vld [vmem:[%s5042_s24 + $0x18] sm:$0xff]   ;;  %v4888_v10 = vld [vmem:[%s5042_s24 + $0x1c8] sm:$0xff]   ;;  %v4889_v11 = vld [vmem:[%s5042_s24 + $0x20] sm:$0xff]  }
  0x13   : > { %4656 = vmatprep.mubr.msk.bf16.mxu0 %vm945_vm0, %v4885_v7  ;;  %4764 = vmatprep.mubr.msk.bf16.mxu1 %vm945_vm0, %v4887_v8  ;;  %v4891_v12 = vld [vmem:[%s5042_s24 + $0x1d0] sm:$0xff]   ;;  %v4890_v13 = vld [vmem:[%s5042_s24 + $0x28] sm:$0xff]   ;;  %v4892_v14 = vld [vmem:[%s5042_s24 + $0x1d8] sm:$0xff]  }
  0x14   : > { %v4893_v15 = vld [vmem:[%s5042_s24 + $0x30] sm:$0xff]   ;;  %v4895_v16 = vld [vmem:[%s5042_s24 + $0x1e0] sm:$0xff]   ;;  %v4894_v17 = vld [vmem:[%s5042_s24 + $0x38] sm:$0xff]  }
  0x15   : > { %v4896_v18 = vld [vmem:[%s5042_s24 + $0x1e8] sm:$0xff]   ;;  %v4897_v19 = vld [vmem:[%s5042_s24 + $0x40] sm:$0xff]   ;;  %v4899_v20 = vld [vmem:[%s5042_s24 + $0x1f0] sm:$0xff]  }
  0x16   : > { %v4898_v21 = vld [vmem:[%s5042_s24 + $0x48] sm:$0xff]   ;;  %v4900_v22 = vld [vmem:[%s5042_s24 + $0x1f8] sm:$0xff]   ;;  %v4901_v23 = vld [vmem:[%s5042_s24 + $0x50] sm:$0xff]  }
  0x17   : > { %v4903_v24 = vld [vmem:[%s5042_s24 + $0x200] sm:$0xff]   ;;  %v4902_v25 = vld [vmem:[%s5042_s24 + $0x58] sm:$0xff]   ;;  %v4904_v26 = vld [vmem:[%s5042_s24 + $0x208] sm:$0xff]  }
  0x18   : > { %v4905_v27 = vld [vmem:[%s5042_s24 + $0x60] sm:$0xff]   ;;  %v4907_v28 = vld [vmem:[%s5042_s24 + $0x210] sm:$0xff]   ;;  %v4906_v29 = vld [vmem:[%s5042_s24 + $0x68] sm:$0xff]  }
  0x19   : > { %v4908_v30 = vld [vmem:[%s5042_s24 + $0x218] sm:$0xff]   ;;  %v4909_v31 = vld [vmem:[%s5042_s24 + $0x70] sm:$0xff]   ;;  %v4911_v32 = vld [vmem:[%s5042_s24 + $0x220] sm:$0xff]  }
  0x1a   : > { %4657 = vmatmul.mubr.msk.bf16.gmra.mrb[4].mxu0 %vm945_vm0, %v4886_v9  ;;  %4765 = vmatmul.mubr.msk.bf16.gmra.mrb[4].mxu1 %vm945_vm0, %v4888_v10  ;;  %v4910_v33 = vld [vmem:[%s5042_s24 + $0x78] sm:$0xff]   ;;  %v4912_v34 = vld [vmem:[%s5042_s24 + $0x228] sm:$0xff]   ;;  %v4913_v35 = vld [vmem:[%s5042_s24 + $0x80] sm:$0xff]  }
  0x1b   : > { %4660 = vmatprep.mubr.msk.bf16.mxu0 %vm945_vm0, %v4889_v11  ;;  %4768 = vmatprep.mubr.msk.bf16.mxu1 %vm945_vm0, %v4891_v12  ;;  %v4915_v36 = vld [vmem:[%s5042_s24 + $0x230] sm:$0xff]   ;;  %v4914_v37 = vld [vmem:[%s5042_s24 + $0x88] sm:$0xff]   ;;  %v4916_v38 = vld [vmem:[%s5042_s24 + $0x238] sm:$0xff]  }
  0x1c   : > { %v4917_v39 = vld [vmem:[%s5042_s24 + $0x90] sm:$0xff]   ;;  %v4919_v40 = vld [vmem:[%s5042_s24 + $0x240] sm:$0xff]   ;;  %v4918_v41 = vld [vmem:[%s5042_s24 + $0x98] sm:$0xff]  }
  0x1d   : > { %v4920_v42 = vld [vmem:[%s5042_s24 + $0x248] sm:$0xff]   ;;  %v4921_v43 = vld [vmem:[%s5042_s24 + $0xa0] sm:$0xff]   ;;  %v4923_v44 = vld [vmem:[%s5042_s24 + $0x250] sm:$0xff]  }
  0x1e   : > { %v4922_v45 = vld [vmem:[%s5042_s24 + $0xa8] sm:$0xff]   ;;  %v4924_v46 = vld [vmem:[%s5042_s24 + $0x258] sm:$0xff]   ;;  %v4925_v47 = vld [vmem:[%s5042_s24 + $0xb0] sm:$0xff]  }
  0x1f   : > { %v4927_v48 = vld [vmem:[%s5042_s24 + $0x260] sm:$0xff]   ;;  %v4926_v49 = vld [vmem:[%s5042_s24 + $0xb8] sm:$0xff]   ;;  %v4928_v50 = vld [vmem:[%s5042_s24 + $0x268] sm:$0xff]  }
  0x20   : > { %v4929_v51 = vld [vmem:[%s5042_s24 + $0xc0] sm:$0xff]   ;;  %v4931_v52 = vld [vmem:[%s5042_s24 + $0x270] sm:$0xff]   ;;  %v4930_v53 = vld [vmem:[%s5042_s24 + $0xc8] sm:$0xff]  }
  0x21   : > { %v4932_v54 = vld [vmem:[%s5042_s24 + $0x278] sm:$0xff]   ;;  %v4933_v55 = vld [vmem:[%s5042_s24 + $0xd0] sm:$0xff]   ;;  %v4935_v56 = vld [vmem:[%s5042_s24 + $0x280] sm:$0xff]  }
  0x22   : > { %4661 = vmatmul.mubr.msk.bf16.gmra.mrb[8].mxu0 %vm945_vm0, %v4890_v13  ;;  %4769 = vmatmul.mubr.msk.bf16.gmra.mrb[8].mxu1 %vm945_vm0, %v4892_v14  ;;  %v4934_v57 = vld [vmem:[%s5042_s24 + $0xd8] sm:$0xff]   ;;  %v4936_v58 = vld [vmem:[%s5042_s24 + $0x288] sm:$0xff]   ;;  %v4937_v59 = vld [vmem:[%s5042_s24 + $0xe0] sm:$0xff]  }
  0x23   : > { %4664 = vmatprep.mubr.msk.bf16.mxu0 %vm945_vm0, %v4893_v15  ;;  %4772 = vmatprep.mubr.msk.bf16.mxu1 %vm945_vm0, %v4895_v16  ;;  %v4939_v60 = vld [vmem:[%s5042_s24 + $0x290] sm:$0xff]   ;;  %v4938_v61 = vld [vmem:[%s5042_s24 + $0xe8] sm:$0xff]   ;;  %v4940_v62 = vld [vmem:[%s5042_s24 + $0x298] sm:$0xff]  }
  0x24   : > { %v4941_v63 = vld [vmem:[%s5042_s24 + $0xf0] sm:$0xff]   ;;  %v4943_v0 = vld [vmem:[%s5042_s24 + $0x2a0] sm:$0xff]   ;;  %v4942_v1 = vld [vmem:[%s5042_s24 + $0xf8] sm:$0xff]  }
  0x25   : > { %v4944_v2 = vld [vmem:[%s5042_s24 + $0x2a8] sm:$0xff]   ;;  %v4945_v3 = vld [vmem:[%s5042_s24 + $0x100] sm:$0xff]   ;;  %v4947_v4 = vld [vmem:[%s5042_s24 + $0x2b0] sm:$0xff]  }
  0x26   : > { %v4946_v5 = vld [vmem:[%s5042_s24 + $0x108] sm:$0xff]   ;;  %v4948_v6 = vld [vmem:[%s5042_s24 + $0x2b8] sm:$0xff]   ;;  %v4949_v7 = vld [vmem:[%s5042_s24 + $0x110] sm:$0xff]  }
  0x27   : > { %v4951_v8 = vld [vmem:[%s5042_s24 + $0x2c0] sm:$0xff]   ;;  %v4950_v9 = vld [vmem:[%s5042_s24 + $0x118] sm:$0xff]   ;;  %v4952_v10 = vld [vmem:[%s5042_s24 + $0x2c8] sm:$0xff]  }
  0x28   : > { %v4953_v11 = vld [vmem:[%s5042_s24 + $0x120] sm:$0xff]   ;;  %v4955_v12 = vld [vmem:[%s5042_s24 + $0x2d0] sm:$0xff]   ;;  %v4954_v13 = vld [vmem:[%s5042_s24 + $0x128] sm:$0xff]  }
  0x29   : > { %v4956_v14 = vld [vmem:[%s5042_s24 + $0x2d8] sm:$0xff]   ;;  %v4957_v15 = vld [vmem:[%s5042_s24 + $0x130] sm:$0xff]   ;;  %v4959_v16 = vld [vmem:[%s5042_s24 + $0x2e0] sm:$0xff]  }
  0x2a   : > { %4665 = vmatmul.mubr.msk.bf16.gmra.mrb[12].mxu0 %vm945_vm0, %v4894_v17  ;;  %4773 = vmatmul.mubr.msk.bf16.gmra.mrb[12].mxu1 %vm945_vm0, %v4896_v18  ;;  %v4958_v17 = vld [vmem:[%s5042_s24 + $0x138] sm:$0xff]   ;;  %v4960_v18 = vld [vmem:[%s5042_s24 + $0x2e8] sm:$0xff]  }
  0x2b   : > { %4668 = vmatprep.mubr.msk.bf16.mxu0 %vm945_vm0, %v4897_v19  ;;  %4776 = vmatprep.mubr.msk.bf16.mxu1 %vm945_vm0, %v4899_v20  ;;  %v4961_v19 = vld [vmem:[%s5042_s24 + $0x140] sm:$0xff]   ;;  %v4963_v20 = vld [vmem:[%s5042_s24 + $0x2f0] sm:$0xff]  }
  0x32   : > { %4669 = vmatmul.mubr.msk.bf16.gmra.mrb[16].mxu0 %vm945_vm0, %v4898_v21  ;;  %4777 = vmatmul.mubr.msk.bf16.gmra.mrb[16].mxu1 %vm945_vm0, %v4900_v22  ;;  %v4962_v21 = vld [vmem:[%s5042_s24 + $0x148] sm:$0xff]   ;;  %v4964_v22 = vld [vmem:[%s5042_s24 + $0x2f8] sm:$0xff]  }
  0x33   : > { %4672 = vmatprep.mubr.msk.bf16.mxu0 %vm945_vm0, %v4901_v23  ;;  %4780 = vmatprep.mubr.msk.bf16.mxu1 %vm945_vm0, %v4903_v24  ;;  %v4965_v23 = vld [vmem:[%s5042_s24 + $0x150] sm:$0xff]   ;;  %v4967_v24 = vld [vmem:[%s5042_s24 + $0x300] sm:$0xff]  }
  0x3a   : > { %4673 = vmatmul.mubr.msk.bf16.gmra.mrb[20].mxu0 %vm945_vm0, %v4902_v25  ;;  %4781 = vmatmul.mubr.msk.bf16.gmra.mrb[20].mxu1 %vm945_vm0, %v4904_v26  ;;  %v4966_v25 = vld [vmem:[%s5042_s24 + $0x158] sm:$0xff]   ;;  %v4968_v26 = vld [vmem:[%s5042_s24 + $0x308] sm:$0xff]  }
  0x3b   : > { %4676 = vmatprep.mubr.msk.bf16.mxu0 %vm945_vm0, %v4905_v27  ;;  %4784 = vmatprep.mubr.msk.bf16.mxu1 %vm945_vm0, %v4907_v28  ;;  %v4969_v27 = vld [vmem:[%s5042_s24 + $0x160] sm:$0xff]   ;;  %v4971_v28 = vld [vmem:[%s5042_s24 + $0x310] sm:$0xff]  }
  0x42   : > { %4677 = vmatmul.mubr.msk.bf16.gmra.mrb[24].mxu0 %vm945_vm0, %v4906_v29  ;;  %4785 = vmatmul.mubr.msk.bf16.gmra.mrb[24].mxu1 %vm945_vm0, %v4908_v30  ;;  %v4970_v29 = vld [vmem:[%s5042_s24 + $0x168] sm:$0xff]   ;;  %v4972_v30 = vld [vmem:[%s5042_s24 + $0x318] sm:$0xff]  }
  0x43   : > { %4680 = vmatprep.mubr.msk.bf16.mxu0 %vm945_vm0, %v4909_v31  ;;  %4788 = vmatprep.mubr.msk.bf16.mxu1 %vm945_vm0, %v4911_v32  ;;  %v4973_v31 = vld [vmem:[%s5042_s24 + $0x170] sm:$0xff]   ;;  %v4975_v32 = vld [vmem:[%s5042_s24 + $0x320] sm:$0xff]  }
  0x4a   : > { %4681 = vmatmul.mubr.msk.bf16.gmra.mrb[28].mxu0 %vm945_vm0, %v4910_v33  ;;  %4789 = vmatmul.mubr.msk.bf16.gmra.mrb[28].mxu1 %vm945_vm0, %v4912_v34  ;;  %v4974_v33 = vld [vmem:[%s5042_s24 + $0x178] sm:$0xff]   ;;  %v4976_v34 = vld [vmem:[%s5042_s24 + $0x328] sm:$0xff]  }
  0x4b   : > { %4684 = vmatprep.mubr.msk.bf16.mxu0 %vm945_vm0, %v4913_v35  ;;  %4792 = vmatprep.mubr.msk.bf16.mxu1 %vm945_vm0, %v4915_v36  ;;  %v4977_v35 = vld [vmem:[%s5042_s24 + $0x180] sm:$0xff]   ;;  %v4979_v36 = vld [vmem:[%s5042_s24 + $0x330] sm:$0xff]  }
  0x52   : > { %4685 = vmatmul.mubr.msk.bf16.gmra.mrb[32].mxu0 %vm945_vm0, %v4914_v37  ;;  %4793 = vmatmul.mubr.msk.bf16.gmra.mrb[32].mxu1 %vm945_vm0, %v4916_v38  ;;  %v4978_v37 = vld [vmem:[%s5042_s24 + $0x188] sm:$0xff]   ;;  %v4980_v38 = vld [vmem:[%s5042_s24 + $0x338] sm:$0xff]  }
  0x53   : > { %4688 = vmatprep.mubr.msk.bf16.mxu0 %vm945_vm0, %v4917_v39  ;;  %4796 = vmatprep.mubr.msk.bf16.mxu1 %vm945_vm0, %v4919_v40  ;;  %v4981_v39 = vld [vmem:[%s5042_s24 + $0x190] sm:$0xff]   ;;  %v4983_v40 = vld [vmem:[%s5042_s24 + $0x340] sm:$0xff]  }
  0x5a   : > { %4689 = vmatmul.mubr.msk.bf16.gmra.mrb[36].mxu0 %vm945_vm0, %v4918_v41  ;;  %4797 = vmatmul.mubr.msk.bf16.gmra.mrb[36].mxu1 %vm945_vm0, %v4920_v42  ;;  %v4982_v41 = vld [vmem:[%s5042_s24 + $0x198] sm:$0xff]   ;;  %v4984_v42 = vld [vmem:[%s5042_s24 + $0x348] ss:$0 sps:$4 sm:$0xff]  }
  0x5b   : > { %4692 = vmatprep.mubr.msk.bf16.mxu0 %vm945_vm0, %v4921_v43  ;;  %4800 = vmatprep.mubr.msk.bf16.mxu1 %vm945_vm0, %v4923_v44  ;;  %v4985_v43 = vld [vmem:[%s5042_s24 + $0x1a0] sm:$0xff]   ;;  %v4986_v44 = vld [vmem:[%s5042_s24 + $0x1a8] sm:$0xff]  }
  0x62   : > { %4693 = vmatmul.mubr.msk.bf16.gmra.mrb[40].mxu0 %vm945_vm0, %v4922_v45  ;;  %4801 = vmatmul.mubr.msk.bf16.gmra.mrb[40].mxu1 %vm945_vm0, %v4924_v46  ;;  %v5259_v45 = vld [vmem:[%s6438_s2] ss:$0 sm:$0xff] }
  0x63   : > { %4696 = vmatprep.mubr.msk.bf16.mxu0 %vm945_vm0, %v4925_v47  ;;  %4804 = vmatprep.mubr.msk.bf16.mxu1 %vm945_vm0, %v4927_v48 }
  0x6a   : > { %4697 = vmatmul.mubr.msk.bf16.gmra.mrb[44].mxu0 %vm945_vm0, %v4926_v49  ;;  %4805 = vmatmul.mubr.msk.bf16.gmra.mrb[44].mxu1 %vm945_vm0, %v4928_v50 }
  0x6b   : > { %4700 = vmatprep.mubr.msk.bf16.mxu0 %vm945_vm0, %v4929_v51  ;;  %4808 = vmatprep.mubr.msk.bf16.mxu1 %vm945_vm0, %v4931_v52 }
  0x72   : > { %4701 = vmatmul.mubr.msk.bf16.gmra.mrb[48].mxu0 %vm945_vm0, %v4930_v53  ;;  %4809 = vmatmul.mubr.msk.bf16.gmra.mrb[48].mxu1 %vm945_vm0, %v4932_v54 }
  0x73   : > { %4704 = vmatprep.mubr.msk.bf16.mxu0 %vm945_vm0, %v4933_v55  ;;  %4812 = vmatprep.mubr.msk.bf16.mxu1 %vm945_vm0, %v4935_v56 }
  0x7a   : > { %4705 = vmatmul.mubr.msk.bf16.gmra.mrb[52].mxu0 %vm945_vm0, %v4934_v57  ;;  %4813 = vmatmul.mubr.msk.bf16.gmra.mrb[52].mxu1 %vm945_vm0, %v4936_v58 }
  0x7b   : > { %4708 = vmatprep.mubr.msk.bf16.mxu0 %vm945_vm0, %v4937_v59  ;;  %4816 = vmatprep.mubr.msk.bf16.mxu1 %vm945_vm0, %v4939_v60 }
  0x82   : > { %4709 = vmatmul.mubr.msk.bf16.gmra.mrb[56].mxu0 %vm945_vm0, %v4938_v61  ;;  %4817 = vmatmul.mubr.msk.bf16.gmra.mrb[56].mxu1 %vm945_vm0, %v4940_v62 }
  0x83   : > { %4712 = vmatprep.mubr.msk.bf16.mxu0 %vm945_vm0, %v4941_v63  ;;  %4820 = vmatprep.mubr.msk.bf16.mxu1 %vm945_vm0, %v4943_v0 }
  0x8a   : > { %4713 = vmatmul.mubr.msk.bf16.gmra.mrb[60].mxu0 %vm945_vm0, %v4942_v1  ;;  %4821 = vmatmul.mubr.msk.bf16.gmra.mrb[60].mxu1 %vm945_vm0, %v4944_v2 }
  0x8b   : > { %4716 = vmatprep.mubr.msk.bf16.mxu0 %vm945_vm0, %v4945_v3  ;;  %4824 = vmatprep.mubr.msk.bf16.mxu1 %vm945_vm0, %v4947_v4 }
  0x92   : > { %4717 = vmatmul.mubr.msk.bf16.gmra.mrb[64].mxu0 %vm945_vm0, %v4946_v5  ;;  %4825 = vmatmul.mubr.msk.bf16.gmra.mrb[64].mxu1 %vm945_vm0, %v4948_v6 }
  0x93   : > { %4720 = vmatprep.mubr.msk.bf16.mxu0 %vm945_vm0, %v4949_v7  ;;  %4828 = vmatprep.mubr.msk.bf16.mxu1 %vm945_vm0, %v4951_v8 }
  0x9a   : > { %4721 = vmatmul.mubr.msk.bf16.gmra.mrb[68].mxu0 %vm945_vm0, %v4950_v9  ;;  %4829 = vmatmul.mubr.msk.bf16.gmra.mrb[68].mxu1 %vm945_vm0, %v4952_v10 }
  0x9b   : > { %4724 = vmatprep.mubr.msk.bf16.mxu0 %vm945_vm0, %v4953_v11  ;;  %4832 = vmatprep.mubr.msk.bf16.mxu1 %vm945_vm0, %v4955_v12 }
  0xa2   : > { %4725 = vmatmul.mubr.msk.bf16.gmra.mrb[72].mxu0 %vm945_vm0, %v4954_v13  ;;  %4833 = vmatmul.mubr.msk.bf16.gmra.mrb[72].mxu1 %vm945_vm0, %v4956_v14 }
  0xa3   : > { %4728 = vmatprep.mubr.msk.bf16.mxu0 %vm945_vm0, %v4957_v15  ;;  %4836 = vmatprep.mubr.msk.bf16.mxu1 %vm945_vm0, %v4959_v16 }
  0xaa   : > { %4729 = vmatmul.mubr.msk.bf16.gmra.mrb[76].mxu0 %vm945_vm0, %v4958_v17  ;;  %4837 = vmatmul.mubr.msk.bf16.gmra.mrb[76].mxu1 %vm945_vm0, %v4960_v18 }
  0xab   : > { %4732 = vmatprep.mubr.msk.bf16.mxu0 %vm945_vm0, %v4961_v19  ;;  %4840 = vmatprep.mubr.msk.bf16.mxu1 %vm945_vm0, %v4963_v20 }
  0xb2   : > { %4733 = vmatmul.mubr.msk.bf16.gmra.mrb[80].mxu0 %vm945_vm0, %v4962_v21  ;;  %4841 = vmatmul.mubr.msk.bf16.gmra.mrb[80].mxu1 %vm945_vm0, %v4964_v22 }
  0xb3   : > { %4736 = vmatprep.mubr.msk.bf16.mxu0 %vm945_vm0, %v4965_v23  ;;  %4844 = vmatprep.mubr.msk.bf16.mxu1 %vm945_vm0, %v4967_v24 }
  0xba   : > { %4737 = vmatmul.mubr.msk.bf16.gmra.mrb[84].mxu0 %vm945_vm0, %v4966_v25  ;;  %4845 = vmatmul.mubr.msk.bf16.gmra.mrb[84].mxu1 %vm945_vm0, %v4968_v26 }
  0xbb   : > { %4740 = vmatprep.mubr.msk.bf16.mxu0 %vm945_vm0, %v4969_v27  ;;  %4848 = vmatprep.mubr.msk.bf16.mxu1 %vm945_vm0, %v4971_v28 }
  0xc2   : > { %4741 = vmatmul.mubr.msk.bf16.gmra.mrb[88].mxu0 %vm945_vm0, %v4970_v29  ;;  %4849 = vmatmul.mubr.msk.bf16.gmra.mrb[88].mxu1 %vm945_vm0, %v4972_v30 }
  0xc3   : > { %4744 = vmatprep.mubr.msk.bf16.mxu0 %vm945_vm0, %v4973_v31  ;;  %4852 = vmatprep.mubr.msk.bf16.mxu1 %vm945_vm0, %v4975_v32 }
  0xca   : > { %4745 = vmatmul.mubr.msk.bf16.gmra.mrb[92].mxu0 %vm945_vm0, %v4974_v33  ;;  %4853 = vmatmul.mubr.msk.bf16.gmra.mrb[92].mxu1 %vm945_vm0, %v4976_v34 }
  0xcb   : > { %4748 = vmatprep.mubr.msk.bf16.mxu0 %vm945_vm0, %v4977_v35  ;;  %4856 = vmatprep.mubr.msk.bf16.mxu1 %vm945_vm0, %v4979_v36 }
  0xd2   : > { %4749 = vmatmul.mubr.msk.bf16.gmra.mrb[96].mxu0 %vm945_vm0, %v4978_v37  ;;  %4857 = vmatmul.mubr.msk.bf16.gmra.mrb[96].mxu1 %vm945_vm0, %v4980_v38 }
  0xd3   : > { %4752 = vmatprep.mubr.msk.bf16.mxu0 %vm945_vm0, %v4981_v39  ;;  %4860 = vmatprep.mubr.msk.bf16.mxu1 %vm945_vm0, %v4983_v40 }
  0xda   : > { %4753 = vmatmul.mubr.msk.bf16.gmra.mrb[100].mxu0 %vm945_vm0, %v4982_v41  ;;  %4861 = vmatmul.mubr.msk.bf16.gmra.mrb[100].mxu1 %vm945_vm0, %v4984_v42 }
  0xdb   : > { %4756 = vmatprep.mubr.msk.bf16.mxu0 %vm945_vm0, %v4985_v43 }
  0xe2   : > { %4757 = vmatmul.mubr.msk.bf16.gmra.mrb[104].mxu0 %vm945_vm0, %v4986_v44 }
  0xe5   : > { %v4654_v46 = vpop.f32.mrb[0].mxu0  ;;  %v4762_v47 = vpop.f32.mrb[0].mxu1 }
  0xe6   : > { %v1307_v48 = vadd.f32 %v4654_v46, %v5259_v45  ;;  %v1298_v49 = vpop.f32.mrb[1].mxu0  ;;  %v1739_v50 = vadd.f32 %v4762_v47, %v5259_v45  ;;  %v1730_v51 = vpop.f32.mrb[1].mxu1 }
  0xe7   : > { %v1299_v52 = vadd.f32 %v5259_v45, %v1298_v49  ;;  %v4655_v53 = vpop.f32.mrb[2].mxu0  ;;  %v1731_v54 = vadd.f32 %v5259_v45, %v1730_v51  ;;  %v4763_v55 = vpop.f32.mrb[2].mxu1 }
  0xe8   : > { %vm2146_vm2 = vcmp.ge.f32.partialorder %v1307_v48, 0.0  ;;  %v2357_v56 = vmul.f32 0.2, %v1307_v48  ;;  %v1310_v57 = vadd.f32 %v4655_v53, %v5259_v45  ;;  %v1301_v58 = vpop.f32.mrb[3].mxu0  ;;  %vm2254_vm3 = vcmp.ge.f32.partialorder %v1739_v50, 0.0  ;;  %v1733_v59 = vpop.f32.mrb[3].mxu1 }
  0xe9   : > { %vm2144_vm4 = vcmp.ge.f32.partialorder %v1299_v52, 0.0  ;;  %v2355_v60 = vmul.f32 0.2, %v1299_v52  ;;  %v1302_v61 = vadd.f32 %v5259_v45, %v1301_v58  ;;  %v2465_v62 = vmul.f32 0.2, %v1739_v50 }
  0xea   : > { %v2568_v63 = vsel %vm2146_vm2, %v1307_v48, %v2357_v56  ;;  %vm2147_vm5 = vcmp.ge.f32.partialorder %v1310_v57, 0.0  ;;  %v2358_v0 = vmul.f32 0.2, %v1310_v57  ;;  %vm2252_vm6 = vcmp.ge.f32.partialorder %v1731_v54, 0.0 }
  0xeb   : > { %v4328_v1 = vpack.c.bf16 %v2568_v63, %v2568_v63  ;;  %v2566_v2 = vsel %vm2144_vm4, %v1299_v52, %v2355_v60  ;;  %vm2145_vm7 = vcmp.ge.f32.partialorder %v1302_v61, 0.0  ;;  %v2356_v3 = vmul.f32 0.2, %v1302_v61 }
  0xec   : > { %v4326_v4 = vpack.c.bf16 %v2566_v2, %v2566_v2  ;;  %v2569_v5 = vsel %vm2147_vm5, %v1310_v57, %v2358_v0  ;;  %v2676_v6 = vsel %vm2254_vm3, %v1739_v50, %v2465_v62  ;;  %v2463_v7 = vmul.f32 0.2, %v1731_v54 }
  0xed   : > { %3625 = vst.msk [vmem:[%s5272_s29 + $0x8] sm:$0xf] %vm3622_vm1, %v4328_v1  ;;  %v4329_v8 = vpack.c.bf16 %v2569_v5, %v2569_v5  ;;  %v2567_v9 = vsel %vm2145_vm7, %v1302_v61, %v2356_v3  ;;  %v4436_v10 = vpack.c.bf16 %v2676_v6, %v2676_v6  ;;  %v1742_v11 = vadd.f32 %v4763_v55, %v5259_v45  ;;  %v4658_v12 = vpop.f32.mrb[4].mxu0  ;;  %v4766_v13 = vpop.f32.mrb[4].mxu1 }
  0xee   : > { %3623 = vst.msk [vmem:[%s5272_s29] sm:$0xf] %vm3622_vm1, %v4326_v4  ;;  %v4327_v14 = vpack.c.bf16 %v2567_v9, %v2567_v9  ;;  %v2674_v15 = vsel %vm2252_vm6, %v1731_v54, %v2463_v7  ;;  %v1734_v16 = vadd.f32 %v5259_v45, %v1733_v59  ;;  %v1323_v17 = vadd.f32 %v4658_v12, %v5259_v45  ;;  %v1314_v18 = vpop.f32.mrb[5].mxu0  ;;  %v1746_v19 = vpop.f32.mrb[5].mxu1 }
  0xef   : > { %3626 = vst.msk [vmem:[%s5272_s29 + $0xc] sm:$0xf] %vm3622_vm1, %v4329_v8  ;;  %3733 = vst.msk [vmem:[%s5272_s29 + $0x1b8] sm:$0xf] %vm3622_vm1, %v4436_v10  ;;  %v4434_v20 = vpack.c.bf16 %v2674_v15, %v2674_v15  ;;  %vm2255_vm8 = vcmp.ge.f32.partialorder %v1742_v11, 0.0  ;;  %v1315_v22 = vadd.f32 %v5259_v45, %v1314_v18  ;;  %v4659_v23 = vpop.f32.mrb[6].mxu0  ;;  %v1755_v42 = vadd.f32 %v4766_v13, %v5259_v45 }
  0xf0   : > { %v2466_v21 = vmul.f32 0.2, %v1742_v11  ;;  %v4767_v24 = vpop.f32.mrb[6].mxu1  ;;  %3624 = vst.msk [vmem:[%s5272_s29 + $0x4] sm:$0xf] %vm3622_vm1, %v4327_v14  ;;  %vm2253_vm9 = vcmp.ge.f32.partialorder %v1734_v16, 0.0  ;;  %v1326_v29 = vadd.f32 %v4659_v23, %v5259_v45  ;;  %v1747_v43 = vadd.f32 %v5259_v45, %v1746_v19 }
  0xf1   : > { %v2464_v25 = vmul.f32 0.2, %v1734_v16  ;;  %vm2150_vm10 = vcmp.ge.f32.partialorder %v1323_v17, 0.0  ;;  %v2361_v26 = vmul.f32 0.2, %v1323_v17  ;;  %vm2148_vm11 = vcmp.ge.f32.partialorder %v1315_v22, 0.0 }
  0xf2   : > { %3731 = vst.msk [vmem:[%s5272_s29 + $0x1b0] sm:$0xf] %vm3622_vm1, %v4434_v20  ;;  %v2677_v27 = vsel %vm2255_vm8, %v1742_v11, %v2466_v21  ;;  %v2359_v28 = vmul.f32 0.2, %v1315_v22  ;;  %v1317_v30 = vpop.f32.mrb[7].mxu0  ;;  %v1749_v31 = vpop.f32.mrb[7].mxu1  ;;  %v1758_v44 = vadd.f32 %v4767_v24, %v5259_v45 }
  0xf3   : > { %v4437_v32 = vpack.c.bf16 %v2677_v27, %v2677_v27  ;;  %v2675_v33 = vsel %vm2253_vm9, %v1734_v16, %v2464_v25  ;;  %v2572_v34 = vsel %vm2150_vm10, %v1323_v17, %v2361_v26  ;;  %v1318_v35 = vadd.f32 %v5259_v45, %v1317_v30 }
  0xf4   : > { %v4435_v36 = vpack.c.bf16 %v2675_v33, %v2675_v33  ;;  %v4332_v37 = vpack.c.bf16 %v2572_v34, %v2572_v34  ;;  %v2570_v38 = vsel %vm2148_vm11, %v1315_v22, %v2359_v28  ;;  %vm2151_vm12 = vcmp.ge.f32.partialorder %v1326_v29, 0.0 }
  0xf5   : > { %3734 = vst.msk [vmem:[%s5272_s29 + $0x1bc] sm:$0xf] %vm3622_vm1, %v4437_v32  ;;  %v4330_v39 = vpack.c.bf16 %v2570_v38, %v2570_v38  ;;  %v2362_v40 = vmul.f32 0.2, %v1326_v29  ;;  %vm2149_vm13 = vcmp.ge.f32.partialorder %v1318_v35, 0.0  ;;  %v1750_v46 = vadd.f32 %v5259_v45, %v1749_v31  ;;  %v4662_v47 = vpop.f32.mrb[8].mxu0 }
  0xf6   : > { %v2360_v41 = vmul.f32 0.2, %v1318_v35  ;;  %3732 = vst.msk [vmem:[%s5272_s29 + $0x1b4] sm:$0xf] %vm3622_vm1, %v4435_v36  ;;  %3629 = vst.msk [vmem:[%s5272_s29 + $0x18] sm:$0xf] %vm3622_vm1, %v4332_v37  ;;  %v1339_v51 = vadd.f32 %v4662_v47, %v5259_v45 }
  0xf7   : > { %v4770_v48 = vpop.f32.mrb[8].mxu1  ;;  %3627 = vst.msk [vmem:[%s5272_s29 + $0x10] sm:$0xf] %vm3622_vm1, %v4330_v39  ;;  %v2573_v49 = vsel %vm2151_vm12, %v1326_v29, %v2362_v40  ;;  %v1330_v52 = vpop.f32.mrb[9].mxu0  ;;  %vm2258_vm14 = vcmp.ge.f32.partialorder %v1755_v42, 0.0  ;;  %vm2256_vm15 = vcmp.ge.f32.partialorder %v1747_v43, 0.0 }
  0xf8   : > { %v2571_v50 = vsel %vm2149_vm13, %v1318_v35, %v2360_v41  ;;  %v1771_v53 = vadd.f32 %v4770_v48, %v5259_v45  ;;  %v1762_v54 = vpop.f32.mrb[9].mxu1  ;;  %v4333_v55 = vpack.c.bf16 %v2573_v49, %v2573_v49  ;;  %v2469_v57 = vmul.f32 0.2, %v1755_v42  ;;  %v4663_v58 = vpop.f32.mrb[10].mxu0 }
  0xf9   : > { %v4331_v56 = vpack.c.bf16 %v2571_v50, %v2571_v50  ;;  %v4771_v59 = vpop.f32.mrb[10].mxu1  ;;  %v2467_v60 = vmul.f32 0.2, %v1747_v43  ;;  %vm2259_vm0 = vcmp.ge.f32.partialorder %v1758_v44, 0.0  ;;  %v2470_v61 = vmul.f32 0.2, %v1758_v44 }
  0xfa   : > { %3630 = vst.msk [vmem:[%s5272_s29 + $0x1c] sm:$0xf] %vm3622_vm1, %v4333_v55  ;;  %v2680_v62 = vsel %vm2258_vm14, %v1755_v42, %v2469_v57  ;;  %vm2257_vm2 = vcmp.ge.f32.partialorder %v1750_v46, 0.0  ;;  %v2468_v63 = vmul.f32 0.2, %v1750_v46  ;;  %vm2154_vm3 = vcmp.ge.f32.partialorder %v1339_v51, 0.0 }
  0xfb   : > { %3628 = vst.msk [vmem:[%s5272_s29 + $0x14] sm:$0xf] %vm3622_vm1, %v4331_v56  ;;  %v1333_v0 = vpop.f32.mrb[11].mxu0  ;;  %v1765_v1 = vpop.f32.mrb[11].mxu1  ;;  %v4440_v2 = vpack.c.bf16 %v2680_v62, %v2680_v62  ;;  %v2678_v3 = vsel %vm2256_vm15, %v1747_v43, %v2467_v60  ;;  %v2681_v4 = vsel %vm2259_vm0, %v1758_v44, %v2470_v61  ;;  %v2365_v5 = vmul.f32 0.2, %v1339_v51 }
  0xfc   : > { %v4438_v6 = vpack.c.bf16 %v2678_v3, %v2678_v3  ;;  %v4441_v7 = vpack.c.bf16 %v2681_v4, %v2681_v4  ;;  %v2679_v8 = vsel %vm2257_vm2, %v1750_v46, %v2468_v63  ;;  %v1331_v9 = vadd.f32 %v5259_v45, %v1330_v52 }
  0xfd   : > { %3737 = vst.msk [vmem:[%s5272_s29 + $0x1c8] sm:$0xf] %vm3622_vm1, %v4440_v2  ;;  %v4439_v10 = vpack.c.bf16 %v2679_v8, %v2679_v8  ;;  %v2576_v11 = vsel %vm2154_vm3, %v1339_v51, %v2365_v5  ;;  %v1342_v12 = vadd.f32 %v4663_v58, %v5259_v45  ;;  %v1334_v13 = vadd.f32 %v5259_v45, %v1333_v0  ;;  %v4666_v16 = vpop.f32.mrb[12].mxu0  ;;  %v4774_v17 = vpop.f32.mrb[12].mxu1 }
  0xfe   : > { %3735 = vst.msk [vmem:[%s5272_s29 + $0x1c0] sm:$0xf] %vm3622_vm1, %v4438_v6  ;;  %3738 = vst.msk [vmem:[%s5272_s29 + $0x1cc] sm:$0xf] %vm3622_vm1, %v4441_v7  ;;  %v4336_v14 = vpack.c.bf16 %v2576_v11, %v2576_v11  ;;  %vm2152_vm4 = vcmp.ge.f32.partialorder %v1331_v9, 0.0  ;;  %vm2262_vm5 = vcmp.ge.f32.partialorder %v1771_v53, 0.0  ;;  %v1763_v22 = vadd.f32 %v5259_v45, %v1762_v54 }
  0xff   : > { %v2363_v15 = vmul.f32 0.2, %v1331_v9  ;;  %3736 = vst.msk [vmem:[%s5272_s29 + $0x1c4] sm:$0xf] %vm3622_vm1, %v4439_v10  ;;  %vm2155_vm6 = vcmp.ge.f32.partialorder %v1342_v12, 0.0  ;;  %vm2153_vm7 = vcmp.ge.f32.partialorder %v1334_v13, 0.0  ;;  %v1774_v23 = vadd.f32 %v4771_v59, %v5259_v45 }
 0x100   : > { %v2366_v18 = vmul.f32 0.2, %v1342_v12  ;;  %v2364_v19 = vmul.f32 0.2, %v1334_v13  ;;  %3633 = vst.msk [vmem:[%s5272_s29 + $0x28] sm:$0xf] %vm3622_vm1, %v4336_v14  ;;  %v1766_v29 = vadd.f32 %v5259_v45, %v1765_v1  ;;  %v1355_v41 = vadd.f32 %v4666_v16, %v5259_v45 }
 0x101   : > { %v2574_v20 = vsel %vm2152_vm4, %v1331_v9, %v2363_v15  ;;  %v2473_v21 = vmul.f32 0.2, %v1771_v53  ;;  %v1346_v24 = vpop.f32.mrb[13].mxu0  ;;  %v1778_v25 = vpop.f32.mrb[13].mxu1  ;;  %vm2260_vm8 = vcmp.ge.f32.partialorder %v1763_v22, 0.0  ;;  %vm2263_vm9 = vcmp.ge.f32.partialorder %v1774_v23, 0.0 }
 0x102   : > { %v4334_v26 = vpack.c.bf16 %v2574_v20, %v2574_v20  ;;  %v2577_v27 = vsel %vm2155_vm6, %v1342_v12, %v2366_v18  ;;  %v2575_v28 = vsel %vm2153_vm7, %v1334_v13, %v2364_v19  ;;  %v4667_v30 = vpop.f32.mrb[14].mxu0  ;;  %v4775_v31 = vpop.f32.mrb[14].mxu1  ;;  %v2471_v38 = vmul.f32 0.2, %v1763_v22 }
 0x103   : > { %v4337_v32 = vpack.c.bf16 %v2577_v27, %v2577_v27  ;;  %v4335_v33 = vpack.c.bf16 %v2575_v28, %v2575_v28  ;;  %v2684_v34 = vsel %vm2262_vm5, %v1771_v53, %v2473_v21  ;;  %v1349_v35 = vpop.f32.mrb[15].mxu0  ;;  %v1781_v36 = vpop.f32.mrb[15].mxu1  ;;  %v2474_v39 = vmul.f32 0.2, %v1774_v23 }
 0x104   : > { %3631 = vst.msk [vmem:[%s5272_s29 + $0x20] sm:$0xf] %vm3622_vm1, %v4334_v26  ;;  %v4444_v37 = vpack.c.bf16 %v2684_v34, %v2684_v34  ;;  %vm2261_vm10 = vcmp.ge.f32.partialorder %v1766_v29, 0.0  ;;  %v2472_v40 = vmul.f32 0.2, %v1766_v29  ;;  %v1347_v42 = vadd.f32 %v5259_v45, %v1346_v24 }
 0x105   : > { %3634 = vst.msk [vmem:[%s5272_s29 + $0x2c] sm:$0xf] %vm3622_vm1, %v4337_v32  ;;  %3632 = vst.msk [vmem:[%s5272_s29 + $0x24] sm:$0xf] %vm3622_vm1, %v4335_v33  ;;  %v2682_v43 = vsel %vm2260_vm8, %v1763_v22, %v2471_v38  ;;  %v2685_v44 = vsel %vm2263_vm9, %v1774_v23, %v2474_v39  ;;  %v1358_v46 = vadd.f32 %v4667_v30, %v5259_v45  ;;  %vm2158_vm11 = vcmp.ge.f32.partialorder %v1355_v41, 0.0  ;;  %v4670_v51 = vpop.f32.mrb[16].mxu0 }
 0x106   : > { %3741 = vst.msk [vmem:[%s5272_s29 + $0x1d8] sm:$0xf] %vm3622_vm1, %v4444_v37  ;;  %v1350_v47 = vadd.f32 %v5259_v45, %v1349_v35  ;;  %v4442_v48 = vpack.c.bf16 %v2682_v43, %v2682_v43  ;;  %v4445_v49 = vpack.c.bf16 %v2685_v44, %v2685_v44  ;;  %v2683_v50 = vsel %vm2261_vm10, %v1766_v29, %v2472_v40  ;;  %v5341_v52 = vpop.f32.mrb[16].mxu1  ;;  %v1362_v56 = vpop.f32.mrb[17].mxu0 }
 0x107   : > { %v4443_v53 = vpack.c.bf16 %v2683_v50, %v2683_v50  ;;  %v2369_v54 = vmul.f32 0.2, %v1355_v41  ;;  %vm2156_vm12 = vcmp.ge.f32.partialorder %v1347_v42, 0.0  ;;  %v2367_v55 = vmul.f32 0.2, %v1347_v42  ;;  %v4671_v63 = vpop.f32.mrb[18].mxu0 }
 0x108   : > { %3739 = vst.msk [vmem:[%s5272_s29 + $0x1d0] sm:$0xf] %vm3622_vm1, %v4442_v48  ;;  %3742 = vst.msk [vmem:[%s5272_s29 + $0x1dc] sm:$0xf] %vm3622_vm1, %v4445_v49  ;;  %vm2159_vm13 = vcmp.ge.f32.partialorder %v1358_v46, 0.0  ;;  %vm2157_vm14 = vcmp.ge.f32.partialorder %v1350_v47, 0.0  ;;  %v1787_v61 = vadd.f32 %v4774_v17, %v5259_v45  ;;  %v1779_v62 = vadd.f32 %v5259_v45, %v1778_v25 }
 0x109   : > { %v2370_v57 = vmul.f32 0.2, %v1358_v46  ;;  %v2368_v58 = vmul.f32 0.2, %v1350_v47  ;;  %3740 = vst.msk [vmem:[%s5272_s29 + $0x1d4] sm:$0xf] %vm3622_vm1, %v4443_v53  ;;  %v2580_v59 = vsel %vm2158_vm11, %v1355_v41, %v2369_v54  ;;  %v2578_v60 = vsel %vm2156_vm12, %v1347_v42, %v2367_v55 }
 0x10a   : > { %v5351_v0 = vpop.f32.mrb[17].mxu1  ;;  %v4340_v1 = vpack.c.bf16 %v2580_v59, %v2580_v59  ;;  %v4338_v2 = vpack.c.bf16 %v2578_v60, %v2578_v60  ;;  %v1365_v5 = vpop.f32.mrb[19].mxu0  ;;  %vm2266_vm15 = vcmp.ge.f32.partialorder %v1787_v61, 0.0  ;;  %v2477_v9 = vmul.f32 0.2, %v1787_v61 }
 0x10b   : > { %v2581_v3 = vsel %vm2159_vm13, %v1358_v46, %v2370_v57  ;;  %v2579_v4 = vsel %vm2157_vm14, %v1350_v47, %v2368_v58  ;;  %v4779_v6 = vpop.f32.mrb[18].mxu1  ;;  %vm2264_vm0 = vcmp.ge.f32.partialorder %v1779_v62, 0.0  ;;  %v2475_v11 = vmul.f32 0.2, %v1779_v62 }
 0x10c   : > { %v4341_v7 = vpack.c.bf16 %v2581_v3, %v2581_v3  ;;  %v4339_v8 = vpack.c.bf16 %v2579_v4, %v2579_v4  ;;  %v1797_v10 = vpop.f32.mrb[19].mxu1  ;;  %3637 = vst.msk [vmem:[%s5272_s29 + $0x38] sm:$0xf] %vm3622_vm1, %v4340_v1  ;;  %3635 = vst.msk [vmem:[%s5272_s29 + $0x30] sm:$0xf] %vm3622_vm1, %v4338_v2  ;;  %v1790_v12 = vadd.f32 %v4775_v31, %v5259_v45 }
 0x10d   : > { %v1782_v13 = vadd.f32 %v5259_v45, %v1781_v36  ;;  %v2688_v14 = vsel %vm2266_vm15, %v1787_v61, %v2477_v9  ;;  %v1371_v15 = vadd.f32 %v4670_v51, %v5259_v45  ;;  %v1363_v16 = vadd.f32 %v5259_v45, %v1362_v56  ;;  %v4674_v21 = vpop.f32.mrb[20].mxu0  ;;  %v5366_v22 = vpop.f32.mrb[20].mxu1 }
 0x10e   : > { %3638 = vst.msk [vmem:[%s5272_s29 + $0x3c] sm:$0xf] %vm3622_vm1, %v4341_v7  ;;  %3636 = vst.msk [vmem:[%s5272_s29 + $0x34] sm:$0xf] %vm3622_vm1, %v4339_v8  ;;  %v1374_v17 = vadd.f32 %v4671_v63, %v5259_v45  ;;  %v4448_v18 = vpack.c.bf16 %v2688_v14, %v2688_v14  ;;  %v2686_v19 = vsel %vm2264_vm0, %v1779_v62, %v2475_v11  ;;  %vm2267_vm2 = vcmp.ge.f32.partialorder %v1790_v12, 0.0  ;;  %v5368_v25 = vpop.f32.mrb[21].mxu0 }
 0x10f   : > { %v2478_v20 = vmul.f32 0.2, %v1790_v12  ;;  %v4446_v23 = vpack.c.bf16 %v2686_v19, %v2686_v19  ;;  %vm2265_vm3 = vcmp.ge.f32.partialorder %v1782_v13, 0.0  ;;  %v2476_v24 = vmul.f32 0.2, %v1782_v13  ;;  %v5370_v26 = vpop.f32.mrb[21].mxu1 }
 0x110   : > { %vm2162_vm4 = vcmp.ge.f32.partialorder %v1371_v15, 0.0  ;;  %3745 = vst.msk [vmem:[%s5272_s29 + $0x1e8] sm:$0xf] %vm3622_vm1, %v4448_v18  ;;  %v2373_v28 = vmul.f32 0.2, %v1371_v15  ;;  %vm2160_vm5 = vcmp.ge.f32.partialorder %v1363_v16, 0.0  ;;  %v1366_v39 = vadd.f32 %v5259_v45, %v1365_v5 }
 0x111   : > { %v2689_v27 = vsel %vm2267_vm2, %v1790_v12, %v2478_v20  ;;  %v2371_v29 = vmul.f32 0.2, %v1363_v16  ;;  %v4675_v30 = vpop.f32.mrb[22].mxu0  ;;  %3743 = vst.msk [vmem:[%s5272_s29 + $0x1e0] sm:$0xf] %vm3622_vm1, %v4446_v23  ;;  %v2687_v32 = vsel %vm2265_vm3, %v1782_v13, %v2476_v24  ;;  %vm2163_vm6 = vcmp.ge.f32.partialorder %v1374_v17, 0.0 }
 0x112   : > { %v4449_v31 = vpack.c.bf16 %v2689_v27, %v2689_v27  ;;  %v2374_v33 = vmul.f32 0.2, %v1374_v17  ;;  %v1381_v34 = vpop.f32.mrb[23].mxu0  ;;  %v5376_v35 = vpop.f32.mrb[22].mxu1  ;;  %v4447_v36 = vpack.c.bf16 %v2687_v32, %v2687_v32  ;;  %v2584_v37 = vsel %vm2162_vm4, %v1371_v15, %v2373_v28 }
 0x113   : > { %v2582_v38 = vsel %vm2160_vm5, %v1363_v16, %v2371_v29  ;;  %v5380_v40 = vpop.f32.mrb[23].mxu1  ;;  %v4344_v41 = vpack.c.bf16 %v2584_v37, %v2584_v37  ;;  %v1803_v44 = vadd.f32 %v5341_v52, %v5259_v45  ;;  %vm2161_vm7 = vcmp.ge.f32.partialorder %v1366_v39, 0.0 }
 0x114   : > { %3746 = vst.msk [vmem:[%s5272_s29 + $0x1ec] sm:$0xf] %vm3622_vm1, %v4449_v31  ;;  %v4342_v42 = vpack.c.bf16 %v2582_v38, %v2582_v38  ;;  %v2585_v43 = vsel %vm2163_vm6, %v1374_v17, %v2374_v33  ;;  %3744 = vst.msk [vmem:[%s5272_s29 + $0x1e4] sm:$0xf] %vm3622_vm1, %v4447_v36  ;;  %v2372_v47 = vmul.f32 0.2, %v1366_v39  ;;  %v1795_v48 = vadd.f32 %v5259_v45, %v5351_v0 }
 0x115   : > { %v4345_v46 = vpack.c.bf16 %v2585_v43, %v2585_v43  ;;  %3641 = vst.msk [vmem:[%s5272_s29 + $0x48] sm:$0xf] %vm3622_vm1, %v4344_v41  ;;  %vm2270_vm8 = vcmp.ge.f32.partialorder %v1803_v44, 0.0  ;;  %v2481_v49 = vmul.f32 0.2, %v1803_v44  ;;  %v1806_v50 = vadd.f32 %v4779_v6, %v5259_v45  ;;  %v5399_v55 = vpop.f32.mrb[24].mxu0 }
 0x116   : > { %3639 = vst.msk [vmem:[%s5272_s29 + $0x40] sm:$0xf] %vm3622_vm1, %v4342_v42  ;;  %v1798_v51 = vadd.f32 %v5259_v45, %v1797_v10  ;;  %v2583_v52 = vsel %vm2161_vm7, %v1366_v39, %v2372_v47  ;;  %vm2268_vm9 = vcmp.ge.f32.partialorder %v1795_v48, 0.0  ;;  %v2479_v53 = vmul.f32 0.2, %v1795_v48  ;;  %v5401_v56 = vpop.f32.mrb[24].mxu1 }
 0x117   : > { %3642 = vst.msk [vmem:[%s5272_s29 + $0x4c] sm:$0xf] %vm3622_vm1, %v4345_v46  ;;  %v1387_v54 = vadd.f32 %v4674_v21, %v5259_v45  ;;  %v4343_v57 = vpack.c.bf16 %v2583_v52, %v2583_v52  ;;  %v2692_v58 = vsel %vm2270_vm8, %v1803_v44, %v2481_v49  ;;  %vm2271_vm10 = vcmp.ge.f32.partialorder %v1806_v50, 0.0  ;;  %v5403_v60 = vpop.f32.mrb[25].mxu0  ;;  %v5405_v61 = vpop.f32.mrb[25].mxu1 }
 0x118   : > { %v2482_v59 = vmul.f32 0.2, %v1806_v50  ;;  %v4452_v62 = vpack.c.bf16 %v2692_v58, %v2692_v58  ;;  %v2690_v63 = vsel %vm2268_vm9, %v1795_v48, %v2479_v53  ;;  %vm2269_vm11 = vcmp.ge.f32.partialorder %v1798_v51, 0.0  ;;  %v5407_v1 = vpop.f32.mrb[26].mxu0  ;;  %v5409_v2 = vpop.f32.mrb[26].mxu1 }
 0x119   : > { %v2480_v0 = vmul.f32 0.2, %v1798_v51  ;;  %3640 = vst.msk [vmem:[%s5272_s29 + $0x44] sm:$0xf] %vm3622_vm1, %v4343_v57  ;;  %v4450_v3 = vpack.c.bf16 %v2690_v63, %v2690_v63  ;;  %vm2166_vm12 = vcmp.ge.f32.partialorder %v1387_v54, 0.0  ;;  %v1397_v6 = vpop.f32.mrb[27].mxu0  ;;  %v1379_v10 = vadd.f32 %v5259_v45, %v5368_v25 }
 0x11a   : > { %v2693_v4 = vsel %vm2271_vm10, %v1806_v50, %v2482_v59  ;;  %v2377_v5 = vmul.f32 0.2, %v1387_v54  ;;  %v5413_v7 = vpop.f32.mrb[27].mxu1  ;;  %3749 = vst.msk [vmem:[%s5272_s29 + $0x1f8] sm:$0xf] %vm3622_vm1, %v4452_v62  ;;  %v1390_v11 = vadd.f32 %v4675_v30, %v5259_v45  ;;  %v1382_v14 = vadd.f32 %v5259_v45, %v1381_v34 }
 0x11b   : > { %v4453_v8 = vpack.c.bf16 %v2693_v4, %v2693_v4  ;;  %v2691_v9 = vsel %vm2269_vm11, %v1798_v51, %v2480_v0  ;;  %3747 = vst.msk [vmem:[%s5272_s29 + $0x1f0] sm:$0xf] %vm3622_vm1, %v4450_v3  ;;  %v1819_v15 = vadd.f32 %v5366_v22, %v5259_v45  ;;  %vm2164_vm13 = vcmp.ge.f32.partialorder %v1379_v10, 0.0 }
 0x11c   : > { %v4451_v12 = vpack.c.bf16 %v2691_v9, %v2691_v9  ;;  %v2588_v13 = vsel %vm2166_vm12, %v1387_v54, %v2377_v5  ;;  %v2375_v17 = vmul.f32 0.2, %v1379_v10  ;;  %vm2167_vm14 = vcmp.ge.f32.partialorder %v1390_v11, 0.0 }
 0x11d   : > { %3750 = vst.msk [vmem:[%s5272_s29 + $0x1fc] sm:$0xf] %vm3622_vm1, %v4453_v8  ;;  %v4348_v16 = vpack.c.bf16 %v2588_v13, %v2588_v13  ;;  %v2378_v18 = vmul.f32 0.2, %v1390_v11  ;;  %vm2165_vm15 = vcmp.ge.f32.partialorder %v1382_v14, 0.0  ;;  %vm2274_vm0 = vcmp.ge.f32.partialorder %v1819_v15, 0.0 }
 0x11e   : > { %3748 = vst.msk [vmem:[%s5272_s29 + $0x1f4] sm:$0xf] %vm3622_vm1, %v4451_v12  ;;  %v2376_v19 = vmul.f32 0.2, %v1382_v14  ;;  %v2586_v20 = vsel %vm2164_vm13, %v1379_v10, %v2375_v17  ;;  %v2485_v21 = vmul.f32 0.2, %v1819_v15  ;;  %v1811_v23 = vadd.f32 %v5259_v45, %v5370_v26 }
 0x11f   : > { %3645 = vst.msk [vmem:[%s5272_s29 + $0x58] sm:$0xf] %vm3622_vm1, %v4348_v16  ;;  %v1822_v22 = vadd.f32 %v5376_v35, %v5259_v45  ;;  %v5435_v24 = vpop.f32.mrb[28].mxu0  ;;  %v5437_v25 = vpop.f32.mrb[28].mxu1  ;;  %v4346_v27 = vpack.c.bf16 %v2586_v20, %v2586_v20  ;;  %v2589_v28 = vsel %vm2167_vm14, %v1390_v11, %v2378_v18  ;;  %v1814_v30 = vadd.f32 %v5259_v45, %v5380_v40 }
 0x120   : > { %v2587_v29 = vsel %vm2165_vm15, %v1382_v14, %v2376_v19  ;;  %v5441_v31 = vpop.f32.mrb[29].mxu0  ;;  %v5443_v32 = vpop.f32.mrb[29].mxu1  ;;  %v4349_v26 = vpack.c.bf16 %v2589_v28, %v2589_v28  ;;  %v2696_v34 = vsel %vm2274_vm0, %v1819_v15, %v2485_v21  ;;  %vm2272_vm2 = vcmp.ge.f32.partialorder %v1811_v23, 0.0 }
 0x121   : > { %v4347_v33 = vpack.c.bf16 %v2587_v29, %v2587_v29  ;;  %v5446_v35 = vpop.f32.mrb[30].mxu0  ;;  %v5448_v36 = vpop.f32.mrb[30].mxu1  ;;  %3643 = vst.msk [vmem:[%s5272_s29 + $0x50] sm:$0xf] %vm3622_vm1, %v4346_v27  ;;  %v4456_v37 = vpack.c.bf16 %v2696_v34, %v2696_v34  ;;  %v2483_v38 = vmul.f32 0.2, %v1811_v23  ;;  %v1403_v42 = vadd.f32 %v5399_v55, %v5259_v45 }
 0x122   : > { %vm2275_vm3 = vcmp.ge.f32.partialorder %v1822_v22, 0.0  ;;  %v2486_v39 = vmul.f32 0.2, %v1822_v22  ;;  %v5452_v40 = vpop.f32.mrb[31].mxu0  ;;  %3646 = vst.msk [vmem:[%s5272_s29 + $0x5c] sm:$0xf] %vm3622_vm1, %v4349_v26  ;;  %v1395_v43 = vadd.f32 %v5259_v45, %v5403_v60  ;;  %v1406_v48 = vadd.f32 %v5407_v1, %v5259_v45 }
 0x123   : > { %3644 = vst.msk [vmem:[%s5272_s29 + $0x54] sm:$0xf] %vm3622_vm1, %v4347_v33  ;;  %vm2273_vm4 = vcmp.ge.f32.partialorder %v1814_v30, 0.0  ;;  %v2484_v41 = vmul.f32 0.2, %v1814_v30  ;;  %v5462_v44 = vpop.f32.mrb[31].mxu1  ;;  %v2694_v46 = vsel %vm2272_vm2, %v1811_v23, %v2483_v38  ;;  %v1398_v49 = vadd.f32 %v5259_v45, %v1397_v6 }
 0x124   : > { %3753 = vst.msk [vmem:[%s5272_s29 + $0x208] sm:$0xf] %vm3622_vm1, %v4456_v37  ;;  %v2697_v47 = vsel %vm2275_vm3, %v1822_v22, %v2486_v39  ;;  %v4454_v50 = vpack.c.bf16 %v2694_v46, %v2694_v46  ;;  %vm2170_vm5 = vcmp.ge.f32.partialorder %v1403_v42, 0.0  ;;  %v2381_v54 = vmul.f32 0.2, %v1403_v42 }
 0x125   : > { %v4457_v51 = vpack.c.bf16 %v2697_v47, %v2697_v47  ;;  %v2695_v52 = vsel %vm2273_vm4, %v1814_v30, %v2484_v41  ;;  %vm2168_vm6 = vcmp.ge.f32.partialorder %v1395_v43, 0.0  ;;  %v2379_v55 = vmul.f32 0.2, %v1395_v43  ;;  %v5480_v0 = vpop.f32.mrb[32].mxu0  ;;  %v5482_v1 = vpop.f32.mrb[32].mxu1 }
 0x126   : > { %v4455_v53 = vpack.c.bf16 %v2695_v52, %v2695_v52  ;;  %3751 = vst.msk [vmem:[%s5272_s29 + $0x200] sm:$0xf] %vm3622_vm1, %v4454_v50  ;;  %vm2171_vm7 = vcmp.ge.f32.partialorder %v1406_v48, 0.0  ;;  %v2382_v57 = vmul.f32 0.2, %v1406_v48  ;;  %vm2169_vm8 = vcmp.ge.f32.partialorder %v1398_v49, 0.0 }
 0x127   : > { %3754 = vst.msk [vmem:[%s5272_s29 + $0x20c] sm:$0xf] %vm3622_vm1, %v4457_v51  ;;  %v2380_v58 = vmul.f32 0.2, %v1398_v49  ;;  %v2592_v59 = vsel %vm2170_vm5, %v1403_v42, %v2381_v54  ;;  %v2590_v60 = vsel %vm2168_vm6, %v1395_v43, %v2379_v55  ;;  %v1835_v62 = vadd.f32 %v5401_v56, %v5259_v45  ;;  %v5484_v8 = vpop.f32.mrb[33].mxu0  ;;  %v5486_v9 = vpop.f32.mrb[33].mxu1 }
 0x128   : > { %3752 = vst.msk [vmem:[%s5272_s29 + $0x204] sm:$0xf] %vm3622_vm1, %v4455_v53  ;;  %v1827_v63 = vadd.f32 %v5259_v45, %v5405_v61  ;;  %v4352_v3 = vpack.c.bf16 %v2592_v59, %v2592_v59  ;;  %v4350_v4 = vpack.c.bf16 %v2590_v60, %v2590_v60  ;;  %v2593_v5 = vsel %vm2171_vm7, %v1406_v48, %v2382_v57  ;;  %v5488_v61 = vpop.f32.mrb[34].mxu0  ;;  %v5490_v12 = vpop.f32.mrb[34].mxu1 }
 0x129   : > { %v2591_v6 = vsel %vm2169_vm8, %v1398_v49, %v2380_v58  ;;  %v4353_v56 = vpack.c.bf16 %v2593_v5, %v2593_v5  ;;  %vm2278_vm9 = vcmp.ge.f32.partialorder %v1835_v62, 0.0  ;;  %v2489_v11 = vmul.f32 0.2, %v1835_v62  ;;  %v5500_v16 = vpop.f32.mrb[35].mxu0  ;;  %v5502_v17 = vpop.f32.mrb[35].mxu1 }
 0x12a   : > { %v4351_v10 = vpack.c.bf16 %v2591_v6, %v2591_v6  ;;  %3649 = vst.msk [vmem:[%s5272_s29 + $0x68] sm:$0xf] %vm3622_vm1, %v4352_v3  ;;  %3647 = vst.msk [vmem:[%s5272_s29 + $0x60] sm:$0xf] %vm3622_vm1, %v4350_v4  ;;  %vm2276_vm10 = vcmp.ge.f32.partialorder %v1827_v63, 0.0  ;;  %v1838_v14 = vadd.f32 %v5409_v2, %v5259_v45  ;;  %v1830_v15 = vadd.f32 %v5259_v45, %v5413_v7 }
 0x12b   : > { %v2487_v13 = vmul.f32 0.2, %v1827_v63  ;;  %3650 = vst.msk [vmem:[%s5272_s29 + $0x6c] sm:$0xf] %vm3622_vm1, %v4353_v56  ;;  %v2700_v18 = vsel %vm2278_vm9, %v1835_v62, %v2489_v11  ;;  %v1419_v19 = vadd.f32 %v5435_v24, %v5259_v45  ;;  %v1411_v20 = vadd.f32 %v5259_v45, %v5441_v31 }
 0x12c   : > { %3648 = vst.msk [vmem:[%s5272_s29 + $0x64] sm:$0xf] %vm3622_vm1, %v4351_v10  ;;  %v1422_v2 = vadd.f32 %v5446_v35, %v5259_v45  ;;  %v4460_v7 = vpack.c.bf16 %v2700_v18, %v2700_v18  ;;  %vm2279_vm11 = vcmp.ge.f32.partialorder %v1838_v14, 0.0  ;;  %v2490_v23 = vmul.f32 0.2, %v1838_v14 }
 0x12d   : > { %v2698_v21 = vsel %vm2276_vm10, %v1827_v63, %v2487_v13  ;;  %vm2277_vm12 = vcmp.ge.f32.partialorder %v1830_v15, 0.0  ;;  %v2488_v27 = vmul.f32 0.2, %v1830_v15  ;;  %vm2174_vm13 = vcmp.ge.f32.partialorder %v1419_v19, 0.0  ;;  %v5516_v30 = vpop.f32.mrb[36].mxu0  ;;  %v5522_v35 = vpop.f32.mrb[36].mxu1 }
 0x12e   : > { %v4458_v22 = vpack.c.bf16 %v2698_v21, %v2698_v21  ;;  %3757 = vst.msk [vmem:[%s5272_s29 + $0x218] sm:$0xf] %vm3622_vm1, %v4460_v7  ;;  %v2701_v28 = vsel %vm2279_vm11, %v1838_v14, %v2490_v23  ;;  %v2385_v29 = vmul.f32 0.2, %v1419_v19  ;;  %vm2172_vm14 = vcmp.ge.f32.partialorder %v1411_v20, 0.0  ;;  %v5520_v34 = vpop.f32.mrb[37].mxu0 }
 0x12f   : > { %v2383_v24 = vmul.f32 0.2, %v1411_v20  ;;  %v4461_v31 = vpack.c.bf16 %v2701_v28, %v2701_v28  ;;  %v2699_v26 = vsel %vm2277_vm12, %v1830_v15, %v2488_v27  ;;  %vm2175_vm15 = vcmp.ge.f32.partialorder %v1422_v2, 0.0  ;;  %v5526_v42 = vpop.f32.mrb[38].mxu0  ;;  %v5528_v43 = vpop.f32.mrb[37].mxu1 }
 0x130   : > { %3755 = vst.msk [vmem:[%s5272_s29 + $0x210] sm:$0xf] %vm3622_vm1, %v4458_v22  ;;  %v2386_v33 = vmul.f32 0.2, %v1422_v2  ;;  %v4459_v37 = vpack.c.bf16 %v2699_v26, %v2699_v26  ;;  %v2596_v38 = vsel %vm2174_vm13, %v1419_v19, %v2385_v29  ;;  %v1414_v41 = vadd.f32 %v5259_v45, %v5452_v40  ;;  %v5534_v50 = vpop.f32.mrb[39].mxu0  ;;  %v5536_v51 = vpop.f32.mrb[38].mxu1 }
 0x131   : > { %v2594_v39 = vsel %vm2172_vm14, %v1411_v20, %v2383_v24  ;;  %3758 = vst.msk [vmem:[%s5272_s29 + $0x21c] sm:$0xf] %vm3622_vm1, %v4461_v31  ;;  %v4356_v46 = vpack.c.bf16 %v2596_v38, %v2596_v38  ;;  %v1851_v49 = vadd.f32 %v5437_v25, %v5259_v45  ;;  %v1843_v53 = vadd.f32 %v5259_v45, %v5443_v32  ;;  %v5542_v54 = vpop.f32.mrb[39].mxu1 }
 0x132   : > { %v4354_v47 = vpack.c.bf16 %v2594_v39, %v2594_v39  ;;  %v2597_v48 = vsel %vm2175_vm15, %v1422_v2, %v2386_v33  ;;  %3756 = vst.msk [vmem:[%s5272_s29 + $0x214] sm:$0xf] %vm3622_vm1, %v4459_v37  ;;  %vm2173_vm0 = vcmp.ge.f32.partialorder %v1414_v41, 0.0  ;;  %v2384_v52 = vmul.f32 0.2, %v1414_v41 }
 0x133   : > { %v4357_v40 = vpack.c.bf16 %v2597_v48, %v2597_v48  ;;  %3653 = vst.msk [vmem:[%s5272_s29 + $0x78] sm:$0xf] %vm3622_vm1, %v4356_v46  ;;  %vm2282_vm2 = vcmp.ge.f32.partialorder %v1851_v49, 0.0  ;;  %v2493_v25 = vmul.f32 0.2, %v1851_v49  ;;  %v1854_v55 = vadd.f32 %v5448_v36, %v5259_v45 }
 0x134   : > { %3651 = vst.msk [vmem:[%s5272_s29 + $0x70] sm:$0xf] %vm3622_vm1, %v4354_v47  ;;  %v1846_v57 = vadd.f32 %v5259_v45, %v5462_v44  ;;  %v2595_v58 = vsel %vm2173_vm0, %v1414_v41, %v2384_v52  ;;  %vm2280_vm3 = vcmp.ge.f32.partialorder %v1843_v53, 0.0  ;;  %v2491_v32 = vmul.f32 0.2, %v1843_v53 }
 0x135   : > { %3654 = vst.msk [vmem:[%s5272_s29 + $0x7c] sm:$0xf] %vm3622_vm1, %v4357_v40  ;;  %v1435_v59 = vadd.f32 %v5480_v0, %v5259_v45  ;;  %v4355_v60 = vpack.c.bf16 %v2595_v58, %v2595_v58  ;;  %v2704_v62 = vsel %vm2282_vm2, %v1851_v49, %v2493_v25  ;;  %vm2283_vm4 = vcmp.ge.f32.partialorder %v1854_v55, 0.0  ;;  %v5556_v5 = vpop.f32.mrb[40].mxu0  ;;  %v5558_v44 = vpop.f32.mrb[40].mxu1 }
 0x136   : > { %v2494_v63 = vmul.f32 0.2, %v1854_v55  ;;  %v4464_v3 = vpack.c.bf16 %v2704_v62, %v2704_v62  ;;  %v2702_v4 = vsel %vm2280_vm3, %v1843_v53, %v2491_v32  ;;  %vm2281_vm5 = vcmp.ge.f32.partialorder %v1846_v57, 0.0  ;;  %v5562_v10 = vpop.f32.mrb[41].mxu0  ;;  %v5564_v11 = vpop.f32.mrb[41].mxu1 }
 0x137   : > { %v2492_v36 = vmul.f32 0.2, %v1846_v57  ;;  %3652 = vst.msk [vmem:[%s5272_s29 + $0x74] sm:$0xf] %vm3622_vm1, %v4355_v60  ;;  %v4462_v6 = vpack.c.bf16 %v2702_v4, %v2702_v4  ;;  %vm2178_vm6 = vcmp.ge.f32.partialorder %v1435_v59, 0.0  ;;  %v1427_v15 = vadd.f32 %v5259_v45, %v5484_v8  ;;  %v5572_v19 = vpop.f32.mrb[42].mxu0 }
 0x138   : > { %v2705_v56 = vsel %vm2283_vm4, %v1854_v55, %v2494_v63  ;;  %v2389_v0 = vmul.f32 0.2, %v1435_v59  ;;  %3761 = vst.msk [vmem:[%s5272_s29 + $0x228] sm:$0xf] %vm3622_vm1, %v4464_v3  ;;  %v1438_v18 = vadd.f32 %v5488_v61, %v5259_v45  ;;  %v5574_v20 = vpop.f32.mrb[42].mxu1  ;;  %v1430_v21 = vadd.f32 %v5259_v45, %v5500_v16  ;;  %v5582_v8 = vpop.f32.mrb[43].mxu0 }
 0x139   : > { %v4465_v13 = vpack.c.bf16 %v2705_v56, %v2705_v56  ;;  %v2703_v14 = vsel %vm2281_vm5, %v1846_v57, %v2492_v36  ;;  %3759 = vst.msk [vmem:[%s5272_s29 + $0x220] sm:$0xf] %vm3622_vm1, %v4462_v6  ;;  %v1867_v23 = vadd.f32 %v5482_v1, %v5259_v45  ;;  %v5584_v22 = vpop.f32.mrb[43].mxu1  ;;  %vm2176_vm7 = vcmp.ge.f32.partialorder %v1427_v15, 0.0 }
 0x13a   : > { %v4463_v2 = vpack.c.bf16 %v2703_v14, %v2703_v14  ;;  %v2600_v7 = vsel %vm2178_vm6, %v1435_v59, %v2389_v0  ;;  %v2387_v27 = vmul.f32 0.2, %v1427_v15  ;;  %vm2179_vm8 = vcmp.ge.f32.partialorder %v1438_v18, 0.0 }
 0x13b   : > { %3762 = vst.msk [vmem:[%s5272_s29 + $0x22c] sm:$0xf] %vm3622_vm1, %v4465_v13  ;;  %v4360_v61 = vpack.c.bf16 %v2600_v7, %v2600_v7  ;;  %v2390_v28 = vmul.f32 0.2, %v1438_v18  ;;  %vm2177_vm9 = vcmp.ge.f32.partialorder %v1430_v21, 0.0  ;;  %vm2286_vm10 = vcmp.ge.f32.partialorder %v1867_v23, 0.0 }
 0x13c   : > { %3760 = vst.msk [vmem:[%s5272_s29 + $0x224] sm:$0xf] %vm3622_vm1, %v4463_v2  ;;  %v2388_v29 = vmul.f32 0.2, %v1430_v21  ;;  %v2598_v1 = vsel %vm2176_vm7, %v1427_v15, %v2387_v27  ;;  %v2497_v16 = vmul.f32 0.2, %v1867_v23  ;;  %v1859_v24 = vadd.f32 %v5259_v45, %v5486_v9 }
 0x13d   : > { %3657 = vst.msk [vmem:[%s5272_s29 + $0x88] sm:$0xf] %vm3622_vm1, %v4360_v61  ;;  %v1870_v31 = vadd.f32 %v5490_v12, %v5259_v45  ;;  %v4358_v26 = vpack.c.bf16 %v2598_v1, %v2598_v1  ;;  %v2601_v33 = vsel %vm2179_vm8, %v1438_v18, %v2390_v28  ;;  %v1862_v38 = vadd.f32 %v5259_v45, %v5502_v17  ;;  %v5598_v47 = vpop.f32.mrb[44].mxu0  ;;  %v5600_v48 = vpop.f32.mrb[44].mxu1  ;;  %v5613_v17 = vld [vmem:[%s6438_s2] ss:$0 sm:$0xff] }
 0x13e   : > { %v2599_v37 = vsel %vm2177_vm9, %v1430_v21, %v2388_v29  ;;  %v4361_v39 = vpack.c.bf16 %v2601_v33, %v2601_v33  ;;  %v2708_v46 = vsel %vm2286_vm10, %v1867_v23, %v2497_v16  ;;  %vm2284_vm11 = vcmp.ge.f32.partialorder %v1859_v24, 0.0  ;;  %v5604_v40 = vpop.f32.mrb[45].mxu0  ;;  %v5621_v55 = vpop.f32.mrb[45].mxu1 }
 0x13f   : > { %v4359_v41 = vpack.c.bf16 %v2599_v37, %v2599_v37  ;;  %3655 = vst.msk [vmem:[%s5272_s29 + $0x80] sm:$0xf] %vm3622_vm1, %v4358_v26  ;;  %v4468_v9 = vpack.c.bf16 %v2708_v46, %v2708_v46  ;;  %v2495_v12 = vmul.f32 0.2, %v1859_v24  ;;  %vm2287_vm12 = vcmp.ge.f32.partialorder %v1870_v31, 0.0  ;;  %v5619_v25 = vpop.f32.mrb[46].mxu0 }
 0x140   : > { %v2498_v49 = vmul.f32 0.2, %v1870_v31  ;;  %3658 = vst.msk [vmem:[%s5272_s29 + $0x8c] sm:$0xf] %vm3622_vm1, %v4361_v39  ;;  %vm2285_vm13 = vcmp.ge.f32.partialorder %v1862_v38, 0.0  ;;  %v1451_v52 = vadd.f32 %v5613_v17, %v5516_v30  ;;  %v1443_v53 = vadd.f32 %v5613_v17, %v5520_v34  ;;  %v5630_v59 = vpop.f32.mrb[47].mxu0 }
 0x141   : > { %3656 = vst.msk [vmem:[%s5272_s29 + $0x84] sm:$0xf] %vm3622_vm1, %v4359_v41  ;;  %v2496_v45 = vmul.f32 0.2, %v1862_v38  ;;  %3765 = vst.msk [vmem:[%s5272_s29 + $0x238] sm:$0xf] %vm3622_vm1, %v4468_v9  ;;  %v2706_v57 = vsel %vm2284_vm11, %v1859_v24, %v2495_v12  ;;  %v1454_v32 = vadd.f32 %v5613_v17, %v5526_v42  ;;  %v1446_v30 = vadd.f32 %v5613_v17, %v5534_v50 }
 0x142   : > { %v2709_v58 = vsel %vm2287_vm12, %v1870_v31, %v2498_v49  ;;  %v5632_v34 = vpop.f32.mrb[46].mxu1  ;;  %v4466_v60 = vpack.c.bf16 %v2706_v57, %v2706_v57  ;;  %vm2182_vm14 = vcmp.ge.f32.partialorder %v1451_v52, 0.0  ;;  %v2393_v36 = vmul.f32 0.2, %v1451_v52 }
 0x143   : > { %v4469_v62 = vpack.c.bf16 %v2709_v58, %v2709_v58  ;;  %v2707_v63 = vsel %vm2285_vm13, %v1862_v38, %v2496_v45  ;;  %v5635_v3 = vpop.f32.mrb[47].mxu1  ;;  %vm2180_vm15 = vcmp.ge.f32.partialorder %v1443_v53, 0.0  ;;  %v2391_v6 = vmul.f32 0.2, %v1443_v53 }
 0x144   : > { %v4467_v4 = vpack.c.bf16 %v2707_v63, %v2707_v63  ;;  %3763 = vst.msk [vmem:[%s5272_s29 + $0x230] sm:$0xf] %vm3622_vm1, %v4466_v60  ;;  %vm2183_vm0 = vcmp.ge.f32.partialorder %v1454_v32, 0.0  ;;  %v2394_v42 = vmul.f32 0.2, %v1454_v32  ;;  %vm2181_vm2 = vcmp.ge.f32.partialorder %v1446_v30, 0.0 }
 0x145   : > { %3766 = vst.msk [vmem:[%s5272_s29 + $0x23c] sm:$0xf] %vm3622_vm1, %v4469_v62  ;;  %v2392_v50 = vmul.f32 0.2, %v1446_v30  ;;  %v2604_v56 = vsel %vm2182_vm14, %v1451_v52, %v2393_v36  ;;  %v2602_v0 = vsel %vm2180_vm15, %v1443_v53, %v2391_v6  ;;  %v1883_v13 = vadd.f32 %v5613_v17, %v5522_v35  ;;  %v5647_v21 = vpop.f32.mrb[48].mxu0  ;;  %v5649_v23 = vpop.f32.mrb[48].mxu1 }
 0x146   : > { %3764 = vst.msk [vmem:[%s5272_s29 + $0x234] sm:$0xf] %vm3622_vm1, %v4467_v4  ;;  %v1875_v14 = vadd.f32 %v5613_v17, %v5528_v43  ;;  %v4364_v15 = vpack.c.bf16 %v2604_v56, %v2604_v56  ;;  %v4362_v18 = vpack.c.bf16 %v2602_v0, %v2602_v0  ;;  %v2605_v2 = vsel %vm2183_vm0, %v1454_v32, %v2394_v42  ;;  %v5651_v29 = vpop.f32.mrb[49].mxu0  ;;  %v5653_v35 = vpop.f32.mrb[49].mxu1 }
 0x147   : > { %v2603_v7 = vsel %vm2181_vm2, %v1446_v30, %v2392_v50  ;;  %v4365_v61 = vpack.c.bf16 %v2605_v2, %v2605_v2  ;;  %vm2290_vm3 = vcmp.ge.f32.partialorder %v1883_v13, 0.0  ;;  %v2501_v28 = vmul.f32 0.2, %v1883_v13  ;;  %v5663_v24 = vpop.f32.mrb[50].mxu0  ;;  %v5665_v31 = vpop.f32.mrb[50].mxu1 }
 0x148   : > { %v4363_v27 = vpack.c.bf16 %v2603_v7, %v2603_v7  ;;  %3661 = vst.msk [vmem:[%s5272_s29 + $0x98] sm:$0xf] %vm3622_vm1, %v4364_v15  ;;  %3659 = vst.msk [vmem:[%s5272_s29 + $0x90] sm:$0xf] %vm3622_vm1, %v4362_v18  ;;  %vm2288_vm4 = vcmp.ge.f32.partialorder %v1875_v14, 0.0  ;;  %v1886_v1 = vadd.f32 %v5613_v17, %v5536_v51  ;;  %v1878_v16 = vadd.f32 %v5613_v17, %v5542_v54  ;;  %v5677_v54 = vpop.f32.mrb[51].mxu0 }
 0x149   : > { %v2499_v43 = vmul.f32 0.2, %v1875_v14  ;;  %3662 = vst.msk [vmem:[%s5272_s29 + $0x9c] sm:$0xf] %vm3622_vm1, %v4365_v61  ;;  %v2712_v26 = vsel %vm2290_vm3, %v1883_v13, %v2501_v28  ;;  %v1467_v33 = vadd.f32 %v5613_v17, %v5556_v5  ;;  %v1459_v37 = vadd.f32 %v5613_v17, %v5562_v10  ;;  %v5679_v38 = vpop.f32.mrb[51].mxu1 }
 0x14a   : > { %3660 = vst.msk [vmem:[%s5272_s29 + $0x94] sm:$0xf] %vm3622_vm1, %v4363_v27  ;;  %v1470_v51 = vadd.f32 %v5613_v17, %v5572_v19  ;;  %v4472_v39 = vpack.c.bf16 %v2712_v26, %v2712_v26  ;;  %vm2291_vm5 = vcmp.ge.f32.partialorder %v1886_v1, 0.0  ;;  %v2502_v46 = vmul.f32 0.2, %v1886_v1 }
 0x14b   : > { %v2710_v41 = vsel %vm2288_vm4, %v1875_v14, %v2499_v43  ;;  %vm2289_vm6 = vcmp.ge.f32.partialorder %v1878_v16, 0.0  ;;  %v2500_v12 = vmul.f32 0.2, %v1878_v16  ;;  %vm2186_vm7 = vcmp.ge.f32.partialorder %v1467_v33, 0.0 }
 0x14c   : > { %v4470_v9 = vpack.c.bf16 %v2710_v41, %v2710_v41  ;;  %3769 = vst.msk [vmem:[%s5272_s29 + $0x248] sm:$0xf] %vm3622_vm1, %v4472_v39  ;;  %v2713_v5 = vsel %vm2291_vm5, %v1886_v1, %v2502_v46  ;;  %v2397_v10 = vmul.f32 0.2, %v1467_v33  ;;  %vm2184_vm8 = vcmp.ge.f32.partialorder %v1459_v37, 0.0 }
 0x14d   : > { %v2395_v19 = vmul.f32 0.2, %v1459_v37  ;;  %v4473_v49 = vpack.c.bf16 %v2713_v5, %v2713_v5  ;;  %v2711_v45 = vsel %vm2289_vm6, %v1878_v16, %v2500_v12  ;;  %vm2187_vm9 = vcmp.ge.f32.partialorder %v1470_v51, 0.0  ;;  %v5687_v30 = vpop.f32.mrb[52].mxu0  ;;  %v5689_v60 = vpop.f32.mrb[52].mxu1 }
 0x14e   : > { %3767 = vst.msk [vmem:[%s5272_s29 + $0x240] sm:$0xf] %vm3622_vm1, %v4470_v9  ;;  %v2398_v52 = vmul.f32 0.2, %v1470_v51  ;;  %v4471_v53 = vpack.c.bf16 %v2711_v45, %v2711_v45  ;;  %v2608_v57 = vsel %vm2186_vm7, %v1467_v33, %v2397_v10  ;;  %v1462_v32 = vadd.f32 %v5613_v17, %v5582_v8  ;;  %v5695_v6 = vpop.f32.mrb[53].mxu0  ;;  %v5697_v42 = vpop.f32.mrb[53].mxu1 }
 0x14f   : > { %v2606_v58 = vsel %vm2184_vm8, %v1459_v37, %v2395_v19  ;;  %3770 = vst.msk [vmem:[%s5272_s29 + $0x24c] sm:$0xf] %vm3622_vm1, %v4473_v49  ;;  %v4368_v62 = vpack.c.bf16 %v2608_v57, %v2608_v57  ;;  %v1899_v36 = vadd.f32 %v5613_v17, %v5558_v44  ;;  %v1891_v56 = vadd.f32 %v5613_v17, %v5564_v11  ;;  %v5703_v0 = vpop.f32.mrb[54].mxu0  ;;  %v5705_v13 = vpop.f32.mrb[54].mxu1 }
 0x150   : > { %v4366_v63 = vpack.c.bf16 %v2606_v58, %v2606_v58  ;;  %v2609_v4 = vsel %vm2187_vm9, %v1470_v51, %v2398_v52  ;;  %3768 = vst.msk [vmem:[%s5272_s29 + $0x244] sm:$0xf] %vm3622_vm1, %v4471_v53  ;;  %vm2185_vm10 = vcmp.ge.f32.partialorder %v1462_v32, 0.0  ;;  %v2396_v50 = vmul.f32 0.2, %v1462_v32  ;;  %v5715_v18 = vpop.f32.mrb[55].mxu0 }
 0x151   : > { %v4369_v8 = vpack.c.bf16 %v2609_v4, %v2609_v4  ;;  %3665 = vst.msk [vmem:[%s5272_s29 + $0xa8] sm:$0xf] %vm3622_vm1, %v4368_v62  ;;  %vm2294_vm11 = vcmp.ge.f32.partialorder %v1899_v36, 0.0  ;;  %v2505_v44 = vmul.f32 0.2, %v1899_v36  ;;  %v1902_v14 = vadd.f32 %v5613_v17, %v5574_v20  ;;  %v5717_v11 = vpop.f32.mrb[55].mxu1 }
 0x152   : > { %3663 = vst.msk [vmem:[%s5272_s29 + $0xa0] sm:$0xf] %vm3622_vm1, %v4366_v63  ;;  %v1894_v15 = vadd.f32 %v5613_v17, %v5584_v22  ;;  %v2607_v2 = vsel %vm2185_vm10, %v1462_v32, %v2396_v50  ;;  %vm2292_vm12 = vcmp.ge.f32.partialorder %v1891_v56, 0.0  ;;  %v2503_v7 = vmul.f32 0.2, %v1891_v56 }
 0x153   : > { %3666 = vst.msk [vmem:[%s5272_s29 + $0xac] sm:$0xf] %vm3622_vm1, %v4369_v8  ;;  %v1483_v61 = vadd.f32 %v5613_v17, %v5598_v47  ;;  %v4367_v27 = vpack.c.bf16 %v2607_v2, %v2607_v2  ;;  %v2716_v28 = vsel %vm2294_vm11, %v1899_v36, %v2505_v44  ;;  %vm2295_vm13 = vcmp.ge.f32.partialorder %v1902_v14, 0.0 }
 0x154   : > { %v2506_v20 = vmul.f32 0.2, %v1902_v14  ;;  %v4476_v43 = vpack.c.bf16 %v2716_v28, %v2716_v28  ;;  %v2714_v22 = vsel %vm2292_vm12, %v1891_v56, %v2503_v7  ;;  %vm2293_vm14 = vcmp.ge.f32.partialorder %v1894_v15, 0.0 }
 0x155   : > { %v2504_v1 = vmul.f32 0.2, %v1894_v15  ;;  %3664 = vst.msk [vmem:[%s5272_s29 + $0xa4] sm:$0xf] %vm3622_vm1, %v4367_v27  ;;  %v4474_v16 = vpack.c.bf16 %v2714_v22, %v2714_v22  ;;  %vm2190_vm15 = vcmp.ge.f32.partialorder %v1483_v61, 0.0  ;;  %v1475_v51 = vadd.f32 %v5613_v17, %v5604_v40  ;;  %v5731_v41 = vpop.f32.mrb[56].mxu0 }
 0x156   : > { %v2717_v26 = vsel %vm2295_vm13, %v1902_v14, %v2506_v20  ;;  %v2401_v33 = vmul.f32 0.2, %v1483_v61  ;;  %3773 = vst.msk [vmem:[%s5272_s29 + $0x258] sm:$0xf] %vm3622_vm1, %v4476_v43  ;;  %v1486_v39 = vadd.f32 %v5613_v17, %v5619_v25  ;;  %v5733_v46 = vpop.f32.mrb[56].mxu1  ;;  %v1478_v5 = vadd.f32 %v5613_v17, %v5630_v59  ;;  %v5741_v40 = vpop.f32.mrb[57].mxu0 }
 0x157   : > { %v4477_v37 = vpack.c.bf16 %v2717_v26, %v2717_v26  ;;  %v2715_v47 = vsel %vm2293_vm14, %v1894_v15, %v2504_v1  ;;  %3771 = vst.msk [vmem:[%s5272_s29 + $0x250] sm:$0xf] %vm3622_vm1, %v4474_v16  ;;  %v1915_v10 = vadd.f32 %v5613_v17, %v5600_v48  ;;  %v5743_v19 = vpop.f32.mrb[57].mxu1  ;;  %vm2188_vm0 = vcmp.ge.f32.partialorder %v1475_v51, 0.0  ;;  %v5747_v45 = vpop.f32.mrb[58].mxu0 }
 0x158   : > { %v4475_v9 = vpack.c.bf16 %v2715_v47, %v2715_v47  ;;  %v2612_v12 = vsel %vm2190_vm15, %v1483_v61, %v2401_v33  ;;  %v2399_v49 = vmul.f32 0.2, %v1475_v51  ;;  %vm2191_vm2 = vcmp.ge.f32.partialorder %v1486_v39, 0.0  ;;  %v5749_v52 = vpop.f32.mrb[58].mxu1  ;;  %v5759_v62 = vpop.f32.mrb[59].mxu0 }
 0x159   : > { %3774 = vst.msk [vmem:[%s5272_s29 + $0x25c] sm:$0xf] %vm3622_vm1, %v4477_v37  ;;  %v4372_v25 = vpack.c.bf16 %v2612_v12, %v2612_v12  ;;  %v2402_v59 = vmul.f32 0.2, %v1486_v39  ;;  %vm2189_vm3 = vcmp.ge.f32.partialorder %v1478_v5, 0.0  ;;  %vm2298_vm4 = vcmp.ge.f32.partialorder %v1915_v10, 0.0 }
 0x15a   : > { %3772 = vst.msk [vmem:[%s5272_s29 + $0x254] sm:$0xf] %vm3622_vm1, %v4475_v9  ;;  %v2400_v53 = vmul.f32 0.2, %v1478_v5  ;;  %v2610_v48 = vsel %vm2188_vm0, %v1475_v51, %v2399_v49  ;;  %v2509_v57 = vmul.f32 0.2, %v1915_v10  ;;  %v1907_v58 = vadd.f32 %v5613_v17, %v5621_v55 }
 0x15b   : > { %3669 = vst.msk [vmem:[%s5272_s29 + $0xb8] sm:$0xf] %vm3622_vm1, %v4372_v25  ;;  %v1918_v32 = vadd.f32 %v5613_v17, %v5632_v34  ;;  %v5761_v63 = vpop.f32.mrb[59].mxu1  ;;  %v4370_v4 = vpack.c.bf16 %v2610_v48, %v2610_v48  ;;  %v2613_v36 = vsel %vm2191_vm2, %v1486_v39, %v2402_v59  ;;  %v1910_v50 = vadd.f32 %v5613_v17, %v5635_v3 }
 0x15c   : > { %v2611_v8 = vsel %vm2189_vm3, %v1478_v5, %v2400_v53  ;;  %v4373_v56 = vpack.c.bf16 %v2613_v36, %v2613_v36  ;;  %v2720_v55 = vsel %vm2298_vm4, %v1915_v10, %v2509_v57  ;;  %vm2296_vm5 = vcmp.ge.f32.partialorder %v1907_v58, 0.0 }
 0x15d   : > { %v4371_v44 = vpack.c.bf16 %v2611_v8, %v2611_v8  ;;  %3667 = vst.msk [vmem:[%s5272_s29 + $0xb0] sm:$0xf] %vm3622_vm1, %v4370_v4  ;;  %v4480_v34 = vpack.c.bf16 %v2720_v55, %v2720_v55  ;;  %v2507_v14 = vmul.f32 0.2, %v1907_v58  ;;  %vm2299_vm6 = vcmp.ge.f32.partialorder %v1918_v32, 0.0  ;;  %v5776_v61 = vpop.f32.mrb[60].mxu0 }
 0x15e   : > { %v2510_v15 = vmul.f32 0.2, %v1918_v32  ;;  %3670 = vst.msk [vmem:[%s5272_s29 + $0xbc] sm:$0xf] %vm3622_vm1, %v4373_v56  ;;  %vm2297_vm7 = vcmp.ge.f32.partialorder %v1910_v50, 0.0  ;;  %v1499_v3 = vadd.f32 %v5613_v17, %v5647_v21  ;;  %v1491_v7 = vadd.f32 %v5613_v17, %v5651_v29  ;;  %v5778_v27 = vpop.f32.mrb[60].mxu1 }
 0x15f   : > { %3668 = vst.msk [vmem:[%s5272_s29 + $0xb4] sm:$0xf] %vm3622_vm1, %v4371_v44  ;;  %v2508_v2 = vmul.f32 0.2, %v1910_v50  ;;  %3777 = vst.msk [vmem:[%s5272_s29 + $0x268] sm:$0xf] %vm3622_vm1, %v4480_v34  ;;  %v2718_v28 = vsel %vm2296_vm5, %v1907_v58, %v2507_v14  ;;  %v1502_v43 = vadd.f32 %v5613_v17, %v5663_v24  ;;  %v1494_v22 = vadd.f32 %v5613_v17, %v5677_v54 }
 0x160   : > { %v2721_v20 = vsel %vm2299_vm6, %v1918_v32, %v2510_v15  ;;  %v5786_v21 = vpop.f32.mrb[61].mxu0  ;;  %v5788_v1 = vpop.f32.mrb[61].mxu1  ;;  %v4478_v29 = vpack.c.bf16 %v2718_v28, %v2718_v28  ;;  %vm2194_vm8 = vcmp.ge.f32.partialorder %v1499_v3, 0.0  ;;  %v2405_v51 = vmul.f32 0.2, %v1499_v3 }
 0x161   : > { %v4481_v16 = vpack.c.bf16 %v2721_v20, %v2721_v20  ;;  %v2719_v26 = vsel %vm2297_vm7, %v1910_v50, %v2508_v2  ;;  %v5790_v33 = vpop.f32.mrb[62].mxu0  ;;  %v5792_v37 = vpop.f32.mrb[62].mxu1  ;;  %vm2192_vm9 = vcmp.ge.f32.partialorder %v1491_v7, 0.0  ;;  %v2403_v24 = vmul.f32 0.2, %v1491_v7 }
 0x162   : > { %v4479_v47 = vpack.c.bf16 %v2719_v26, %v2719_v26  ;;  %v5794_v39 = vpop.f32.mrb[63].mxu0  ;;  %3775 = vst.msk [vmem:[%s5272_s29 + $0x260] sm:$0xf] %vm3622_vm1, %v4478_v29  ;;  %vm2195_vm10 = vcmp.ge.f32.partialorder %v1502_v43, 0.0  ;;  %v2406_v54 = vmul.f32 0.2, %v1502_v43  ;;  %v2616_v12 = vsel %vm2194_vm8, %v1499_v3, %v2405_v51 }
 0x163   : > { %3778 = vst.msk [vmem:[%s5272_s29 + $0x26c] sm:$0xf] %vm3622_vm1, %v4481_v16  ;;  %vm2193_vm11 = vcmp.ge.f32.partialorder %v1494_v22, 0.0  ;;  %v2404_v9 = vmul.f32 0.2, %v1494_v22  ;;  %v2614_v5 = vsel %vm2192_vm9, %v1491_v7, %v2403_v24  ;;  %v1931_v10 = vadd.f32 %v5613_v17, %v5649_v23  ;;  %v5806_v49 = vpop.f32.mrb[63].mxu1 }
 0x164   : > { %3776 = vst.msk [vmem:[%s5272_s29 + $0x264] sm:$0xf] %vm3622_vm1, %v4479_v47  ;;  %v1923_v25 = vadd.f32 %v5613_v17, %v5653_v35  ;;  %v4376_v59 = vpack.c.bf16 %v2616_v12, %v2616_v12  ;;  %v4374_v53 = vpack.c.bf16 %v2614_v5, %v2614_v5  ;;  %v2617_v48 = vsel %vm2195_vm10, %v1502_v43, %v2406_v54 }
 0x165   : > { %v2615_v57 = vsel %vm2193_vm11, %v1494_v22, %v2404_v9  ;;  %v4377_v58 = vpack.c.bf16 %v2617_v48, %v2617_v48  ;;  %vm2302_vm12 = vcmp.ge.f32.partialorder %v1931_v10, 0.0  ;;  %v2513_v4 = vmul.f32 0.2, %v1931_v10  ;;  %v5816_v8 = vpop.f32.mrb[64].mxu0  ;;  %v5818_v50 = vpop.f32.mrb[64].mxu1 }
 0x166   : > { %v4375_v32 = vpack.c.bf16 %v2615_v57, %v2615_v57  ;;  %3673 = vst.msk [vmem:[%s5272_s29 + $0xc8] sm:$0xf] %vm3622_vm1, %v4376_v59  ;;  %3671 = vst.msk [vmem:[%s5272_s29 + $0xc0] sm:$0xf] %vm3622_vm1, %v4374_v53  ;;  %vm2300_vm13 = vcmp.ge.f32.partialorder %v1923_v25, 0.0  ;;  %v1934_v35 = vadd.f32 %v5613_v17, %v5665_v31  ;;  %v1926_v36 = vadd.f32 %v5613_v17, %v5679_v38  ;;  %v5830_v38 = vpop.f32.mrb[65].mxu0 }
 0x167   : > { %v2511_v23 = vmul.f32 0.2, %v1923_v25  ;;  %3674 = vst.msk [vmem:[%s5272_s29 + $0xcc] sm:$0xf] %vm3622_vm1, %v4377_v58  ;;  %v2724_v56 = vsel %vm2302_vm12, %v1931_v10, %v2513_v4  ;;  %v1515_v44 = vadd.f32 %v5613_v17, %v5687_v30  ;;  %v1507_v55 = vadd.f32 %v5613_v17, %v5695_v6  ;;  %v5832_v34 = vpop.f32.mrb[65].mxu1  ;;  %v5834_v3 = vpop.f32.mrb[66].mxu0 }
 0x168   : > { %3672 = vst.msk [vmem:[%s5272_s29 + $0xc4] sm:$0xf] %vm3622_vm1, %v4375_v32  ;;  %v1518_v31 = vadd.f32 %v5613_v17, %v5703_v0  ;;  %v4484_v14 = vpack.c.bf16 %v2724_v56, %v2724_v56  ;;  %vm2303_vm14 = vcmp.ge.f32.partialorder %v1934_v35, 0.0  ;;  %v2514_v2 = vmul.f32 0.2, %v1934_v35  ;;  %v5836_v7 = vpop.f32.mrb[66].mxu1 }
 0x169   : > { %v2722_v15 = vsel %vm2300_vm13, %v1923_v25, %v2511_v23  ;;  %vm2301_vm15 = vcmp.ge.f32.partialorder %v1926_v36, 0.0  ;;  %v2512_v6 = vmul.f32 0.2, %v1926_v36  ;;  %vm2198_vm0 = vcmp.ge.f32.partialorder %v1515_v44, 0.0  ;;  %v5838_v28 = vpop.f32.mrb[67].mxu0  ;;  %v5840_v0 = vpop.f32.mrb[67].mxu1 }
 0x16a   : > { %v4482_v30 = vpack.c.bf16 %v2722_v15, %v2722_v15  ;;  %3781 = vst.msk [vmem:[%s5272_s29 + $0x278] sm:$0xf] %vm3622_vm1, %v4484_v14  ;;  %v2725_v20 = vsel %vm2303_vm14, %v1934_v35, %v2514_v2  ;;  %v2409_v43 = vmul.f32 0.2, %v1515_v44  ;;  %vm2196_vm2 = vcmp.ge.f32.partialorder %v1507_v55, 0.0 }
 0x16b   : > { %v2407_v22 = vmul.f32 0.2, %v1507_v55  ;;  %v4485_v29 = vpack.c.bf16 %v2725_v20, %v2725_v20  ;;  %v2723_v16 = vsel %vm2301_vm15, %v1926_v36, %v2512_v6  ;;  %vm2199_vm3 = vcmp.ge.f32.partialorder %v1518_v31, 0.0 }
 0x16c   : > { %3779 = vst.msk [vmem:[%s5272_s29 + $0x270] sm:$0xf] %vm3622_vm1, %v4482_v30  ;;  %v2410_v26 = vmul.f32 0.2, %v1518_v31  ;;  %v4483_v47 = vpack.c.bf16 %v2723_v16, %v2723_v16  ;;  %v2620_v51 = vsel %vm2198_vm0, %v1515_v44, %v2409_v43  ;;  %v1510_v54 = vadd.f32 %v5613_v17, %v5715_v18 }
 0x16d   : > { %v2618_v24 = vsel %vm2196_vm2, %v1507_v55, %v2407_v22  ;;  %3782 = vst.msk [vmem:[%s5272_s29 + $0x27c] sm:$0xf] %vm3622_vm1, %v4485_v29  ;;  %v4380_v9 = vpack.c.bf16 %v2620_v51, %v2620_v51  ;;  %v1947_v10 = vadd.f32 %v5613_v17, %v5689_v60  ;;  %v1939_v53 = vadd.f32 %v5613_v17, %v5697_v42  ;;  %v5856_v48 = vpop.f32.mrb[68].mxu0  ;;  %v5858_v18 = vpop.f32.mrb[68].mxu1 }
 0x16e   : > { %v4378_v12 = vpack.c.bf16 %v2618_v24, %v2618_v24  ;;  %v2621_v5 = vsel %vm2199_vm3, %v1518_v31, %v2410_v26  ;;  %3780 = vst.msk [vmem:[%s5272_s29 + $0x274] sm:$0xf] %vm3622_vm1, %v4483_v47  ;;  %vm2197_vm4 = vcmp.ge.f32.partialorder %v1510_v54, 0.0  ;;  %v2408_v59 = vmul.f32 0.2, %v1510_v54  ;;  %v5868_v32 = vpop.f32.mrb[69].mxu0 }
 0x16f   : > { %v4381_v25 = vpack.c.bf16 %v2621_v5, %v2621_v5  ;;  %3677 = vst.msk [vmem:[%s5272_s29 + $0xd8] sm:$0xf] %vm3622_vm1, %v4380_v9  ;;  %vm2306_vm5 = vcmp.ge.f32.partialorder %v1947_v10, 0.0  ;;  %v2517_v57 = vmul.f32 0.2, %v1947_v10  ;;  %v1950_v60 = vadd.f32 %v5613_v17, %v5705_v13  ;;  %v5870_v4 = vpop.f32.mrb[69].mxu1 }
 0x170   : > { %3675 = vst.msk [vmem:[%s5272_s29 + $0xd0] sm:$0xf] %vm3622_vm1, %v4378_v12  ;;  %v1942_v58 = vadd.f32 %v5613_v17, %v5717_v11  ;;  %v2619_v42 = vsel %vm2197_vm4, %v1510_v54, %v2408_v59  ;;  %vm2304_vm6 = vcmp.ge.f32.partialorder %v1939_v53, 0.0  ;;  %v2515_v23 = vmul.f32 0.2, %v1939_v53  ;;  %v5876_v36 = vpop.f32.mrb[70].mxu0 }
 0x171   : > { %3678 = vst.msk [vmem:[%s5272_s29 + $0xdc] sm:$0xf] %vm3622_vm1, %v4381_v25  ;;  %v1531_v35 = vadd.f32 %v5613_v17, %v5731_v41  ;;  %v5878_v56 = vpop.f32.mrb[70].mxu1  ;;  %v4379_v13 = vpack.c.bf16 %v2619_v42, %v2619_v42  ;;  %v2728_v11 = vsel %vm2306_vm5, %v1947_v10, %v2517_v57  ;;  %vm2307_vm7 = vcmp.ge.f32.partialorder %v1950_v60, 0.0  ;;  %v5880_v55 = vpop.f32.mrb[71].mxu0 }
 0x172   : > { %v2518_v44 = vmul.f32 0.2, %v1950_v60  ;;  %v5882_v31 = vpop.f32.mrb[71].mxu1  ;;  %v4488_v14 = vpack.c.bf16 %v2728_v11, %v2728_v11  ;;  %v2726_v15 = vsel %vm2304_vm6, %v1939_v53, %v2515_v23  ;;  %vm2305_vm8 = vcmp.ge.f32.partialorder %v1942_v58, 0.0 }
 0x173   : > { %v2516_v2 = vmul.f32 0.2, %v1942_v58  ;;  %3676 = vst.msk [vmem:[%s5272_s29 + $0xd4] sm:$0xf] %vm3622_vm1, %v4379_v13  ;;  %v4486_v41 = vpack.c.bf16 %v2726_v15, %v2726_v15  ;;  %vm2202_vm9 = vcmp.ge.f32.partialorder %v1531_v35, 0.0  ;;  %v1523_v22 = vadd.f32 %v5613_v17, %v5741_v40 }
 0x174   : > { %v2729_v30 = vsel %vm2307_vm7, %v1950_v60, %v2518_v44  ;;  %v2413_v6 = vmul.f32 0.2, %v1531_v35  ;;  %3785 = vst.msk [vmem:[%s5272_s29 + $0x288] sm:$0xf] %vm3622_vm1, %v4488_v14  ;;  %v1534_v29 = vadd.f32 %v5613_v17, %v5747_v45  ;;  %v1526_v47 = vadd.f32 %v5613_v17, %v5759_v62 }
 0x175   : > { %v4489_v20 = vpack.c.bf16 %v2729_v30, %v2729_v30  ;;  %v2727_v43 = vsel %vm2305_vm8, %v1942_v58, %v2516_v2  ;;  %3783 = vst.msk [vmem:[%s5272_s29 + $0x280] sm:$0xf] %vm3622_vm1, %v4486_v41  ;;  %v1963_v51 = vadd.f32 %v5613_v17, %v5733_v46  ;;  %vm2200_vm10 = vcmp.ge.f32.partialorder %v1523_v22, 0.0  ;;  %v5900_v40 = vpop.f32.mrb[72].mxu0  ;;  %v5902_v45 = vpop.f32.mrb[72].mxu1 }
 0x176   : > { %v4487_v16 = vpack.c.bf16 %v2727_v43, %v2727_v43  ;;  %v2624_v26 = vsel %vm2202_vm9, %v1531_v35, %v2413_v6  ;;  %v2411_v54 = vmul.f32 0.2, %v1523_v22  ;;  %vm2203_vm11 = vcmp.ge.f32.partialorder %v1534_v29, 0.0  ;;  %v5912_v25 = vpop.f32.mrb[73].mxu0  ;;  %v5914_v59 = vpop.f32.mrb[73].mxu1 }
 0x177   : > { %3786 = vst.msk [vmem:[%s5272_s29 + $0x28c] sm:$0xf] %vm3622_vm1, %v4489_v20  ;;  %v4384_v24 = vpack.c.bf16 %v2624_v26, %v2624_v26  ;;  %v2414_v9 = vmul.f32 0.2, %v1534_v29  ;;  %vm2201_vm12 = vcmp.ge.f32.partialorder %v1526_v47, 0.0  ;;  %vm2310_vm13 = vcmp.ge.f32.partialorder %v1963_v51, 0.0 }
 0x178   : > { %3784 = vst.msk [vmem:[%s5272_s29 + $0x284] sm:$0xf] %vm3622_vm1, %v4487_v16  ;;  %v2412_v12 = vmul.f32 0.2, %v1526_v47  ;;  %v2622_v62 = vsel %vm2200_vm10, %v1523_v22, %v2411_v54  ;;  %v2521_v46 = vmul.f32 0.2, %v1963_v51  ;;  %v1955_v5 = vadd.f32 %v5613_v17, %v5743_v19 }
 0x179   : > { %3681 = vst.msk [vmem:[%s5272_s29 + $0xe8] sm:$0xf] %vm3622_vm1, %v4384_v24  ;;  %v1966_v10 = vadd.f32 %v5613_v17, %v5749_v52  ;;  %v4382_v53 = vpack.c.bf16 %v2622_v62, %v2622_v62  ;;  %v2625_v57 = vsel %vm2203_vm11, %v1534_v29, %v2414_v9  ;;  %v1958_v58 = vadd.f32 %v5613_v17, %v5761_v63  ;;  %v5919_v42 = vpop.f32.mrb[74].mxu0  ;;  %v5921_v19 = vpop.f32.mrb[74].mxu1 }
 0x17a   : > { %v2623_v60 = vsel %vm2201_vm12, %v1526_v47, %v2412_v12  ;;  %v4385_v23 = vpack.c.bf16 %v2625_v57, %v2625_v57  ;;  %v2732_v52 = vsel %vm2310_vm13, %v1963_v51, %v2521_v46  ;;  %vm2308_vm14 = vcmp.ge.f32.partialorder %v1955_v5, 0.0  ;;  %v5924_v13 = vpop.f32.mrb[75].mxu0  ;;  %v5926_v11 = vpop.f32.mrb[75].mxu1 }
 0x17b   : > { %v4383_v35 = vpack.c.bf16 %v2623_v60, %v2623_v60  ;;  %3679 = vst.msk [vmem:[%s5272_s29 + $0xe0] sm:$0xf] %vm3622_vm1, %v4382_v53  ;;  %v4492_v44 = vpack.c.bf16 %v2732_v52, %v2732_v52  ;;  %v2519_v14 = vmul.f32 0.2, %v1955_v5  ;;  %vm2311_vm15 = vcmp.ge.f32.partialorder %v1966_v10, 0.0 }
 0x17c   : > { %v2522_v63 = vmul.f32 0.2, %v1966_v10  ;;  %3682 = vst.msk [vmem:[%s5272_s29 + $0xec] sm:$0xf] %vm3622_vm1, %v4385_v23  ;;  %vm2309_vm0 = vcmp.ge.f32.partialorder %v1958_v58, 0.0  ;;  %v1547_v2 = vadd.f32 %v5613_v17, %v5776_v61  ;;  %v1539_v41 = vadd.f32 %v5613_v17, %v5786_v21 }
 0x17d   : > { %3680 = vst.msk [vmem:[%s5272_s29 + $0xe4] sm:$0xf] %vm3622_vm1, %v4383_v35  ;;  %v2520_v15 = vmul.f32 0.2, %v1958_v58  ;;  %3789 = vst.msk [vmem:[%s5272_s29 + $0x298] sm:$0xf] %vm3622_vm1, %v4492_v44  ;;  %v2730_v30 = vsel %vm2308_vm14, %v1955_v5, %v2519_v14  ;;  %v1550_v20 = vadd.f32 %v5613_v17, %v5790_v33  ;;  %v1542_v43 = vadd.f32 %v5613_v17, %v5794_v39 }
 0x17e   : > { %v2733_v6 = vsel %vm2311_vm15, %v1966_v10, %v2522_v63  ;;  %v4490_v22 = vpack.c.bf16 %v2730_v30, %v2730_v30  ;;  %vm2206_vm2 = vcmp.ge.f32.partialorder %v1547_v2, 0.0  ;;  %v5944_v61 = vpop.f32.mrb[76].mxu0  ;;  %v5946_v21 = vpop.f32.mrb[76].mxu1  ;;  %v2417_v47 = vmul.f32 0.2, %v1547_v2 }
 0x17f   : > { %v4493_v29 = vpack.c.bf16 %v2733_v6, %v2733_v6  ;;  %v2731_v16 = vsel %vm2309_vm0, %v1958_v58, %v2520_v15  ;;  %vm2204_vm3 = vcmp.ge.f32.partialorder %v1539_v41, 0.0  ;;  %v2415_v51 = vmul.f32 0.2, %v1539_v41  ;;  %v5948_v24 = vpop.f32.mrb[77].mxu0  ;;  %v5962_v5 = vpop.f32.mrb[77].mxu1 }
 0x180   : > { %v4491_v26 = vpack.c.bf16 %v2731_v16, %v2731_v16  ;;  %3787 = vst.msk [vmem:[%s5272_s29 + $0x290] sm:$0xf] %vm3622_vm1, %v4490_v22  ;;  %vm2207_vm4 = vcmp.ge.f32.partialorder %v1550_v20, 0.0  ;;  %v2418_v33 = vmul.f32 0.2, %v1550_v20  ;;  %vm2205_vm5 = vcmp.ge.f32.partialorder %v1542_v43, 0.0 }
 0x181   : > { %3790 = vst.msk [vmem:[%s5272_s29 + $0x29c] sm:$0xf] %vm3622_vm1, %v4493_v29  ;;  %v2416_v39 = vmul.f32 0.2, %v1542_v43  ;;  %v2628_v54 = vsel %vm2206_vm2, %v1547_v2, %v2417_v47  ;;  %v2626_v9 = vsel %vm2204_vm3, %v1539_v41, %v2415_v51  ;;  %v1979_v12 = vadd.f32 %v5613_v17, %v5778_v27  ;;  %v5960_v46 = vpop.f32.mrb[78].mxu0  ;;  %v5966_v23 = vpop.f32.mrb[78].mxu1 }
 0x182   : > { %3788 = vst.msk [vmem:[%s5272_s29 + $0x294] sm:$0xf] %vm3622_vm1, %v4491_v26  ;;  %v1971_v62 = vadd.f32 %v5613_v17, %v5788_v1  ;;  %v4388_v10 = vpack.c.bf16 %v2628_v54, %v2628_v54  ;;  %v4386_v53 = vpack.c.bf16 %v2626_v9, %v2626_v9  ;;  %v2629_v57 = vsel %vm2207_vm4, %v1550_v20, %v2418_v33  ;;  %v5964_v58 = vpop.f32.mrb[79].mxu0  ;;  %v5968_v44 = vpop.f32.mrb[79].mxu1 }
 0x183   : > { %v2627_v60 = vsel %vm2205_vm5, %v1542_v43, %v2416_v39  ;;  %v4389_v35 = vpack.c.bf16 %v2629_v57, %v2629_v57  ;;  %vm2314_vm6 = vcmp.ge.f32.partialorder %v1979_v12, 0.0  ;;  %v2525_v52 = vmul.f32 0.2, %v1979_v12 }
 0x184   : > { %v4387_v27 = vpack.c.bf16 %v2627_v60, %v2627_v60  ;;  %3685 = vst.msk [vmem:[%s5272_s29 + $0xf8] sm:$0xf] %vm3622_vm1, %v4388_v10  ;;  %3683 = vst.msk [vmem:[%s5272_s29 + $0xf0] sm:$0xf] %vm3622_vm1, %v4386_v53  ;;  %vm2312_vm7 = vcmp.ge.f32.partialorder %v1971_v62, 0.0  ;;  %v1982_v14 = vadd.f32 %v5613_v17, %v5792_v37  ;;  %v1974_v63 = vadd.f32 %v5613_v17, %v5806_v49 }
 0x185   : > { %v2523_v1 = vmul.f32 0.2, %v1971_v62  ;;  %3686 = vst.msk [vmem:[%s5272_s29 + $0xfc] sm:$0xf] %vm3622_vm1, %v4389_v35  ;;  %v2736_v15 = vsel %vm2314_vm6, %v1979_v12, %v2525_v52  ;;  %v1563_v2 = vadd.f32 %v5613_v17, %v5816_v8  ;;  %v1555_v41 = vadd.f32 %v5613_v17, %v5830_v38  ;;  %v5988_v20 = vpop.f32.mrb[80].mxu0  ;;  %v5990_v43 = vpop.f32.mrb[80].mxu1 }
 0x186   : > { %3684 = vst.msk [vmem:[%s5272_s29 + $0xf4] sm:$0xf] %vm3622_vm1, %v4387_v27  ;;  %v1566_v30 = vadd.f32 %v5613_v17, %v5834_v3  ;;  %v4496_v6 = vpack.c.bf16 %v2736_v15, %v2736_v15  ;;  %vm2315_vm8 = vcmp.ge.f32.partialorder %v1982_v14, 0.0  ;;  %v2526_v49 = vmul.f32 0.2, %v1982_v14  ;;  %v5992_v8 = vpop.f32.mrb[81].mxu0 }
 0x187   : > { %v2734_v37 = vsel %vm2312_vm7, %v1971_v62, %v2523_v1  ;;  %vm2313_vm9 = vcmp.ge.f32.partialorder %v1974_v63, 0.0  ;;  %v2524_v29 = vmul.f32 0.2, %v1974_v63  ;;  %vm2210_vm10 = vcmp.ge.f32.partialorder %v1563_v2, 0.0  ;;  %v5994_v16 = vpop.f32.mrb[81].mxu1  ;;  %v5998_v47 = vpop.f32.mrb[82].mxu0 }
 0x188   : > { %v4494_v22 = vpack.c.bf16 %v2734_v37, %v2734_v37  ;;  %3793 = vst.msk [vmem:[%s5272_s29 + $0x2a8] sm:$0xf] %vm3622_vm1, %v4496_v6  ;;  %v2737_v38 = vsel %vm2315_vm8, %v1982_v14, %v2526_v49  ;;  %v2421_v3 = vmul.f32 0.2, %v1563_v2  ;;  %vm2208_vm11 = vcmp.ge.f32.partialorder %v1555_v41, 0.0  ;;  %v6002_v54 = vpop.f32.mrb[83].mxu0 }
 0x189   : > { %v2419_v26 = vmul.f32 0.2, %v1555_v41  ;;  %v4497_v51 = vpack.c.bf16 %v2737_v38, %v2737_v38  ;;  %v2735_v33 = vsel %vm2313_vm9, %v1974_v63, %v2524_v29  ;;  %vm2211_vm12 = vcmp.ge.f32.partialorder %v1566_v30, 0.0  ;;  %v6004_v9 = vpop.f32.mrb[82].mxu1 }
 0x18a   : > { %3791 = vst.msk [vmem:[%s5272_s29 + $0x2a0] sm:$0xf] %vm3622_vm1, %v4494_v22  ;;  %v2422_v39 = vmul.f32 0.2, %v1566_v30  ;;  %v4495_v12 = vpack.c.bf16 %v2735_v33, %v2735_v33  ;;  %v2632_v62 = vsel %vm2210_vm10, %v1563_v2, %v2421_v3  ;;  %v1558_v53 = vadd.f32 %v5613_v17, %v5838_v28  ;;  %v6009_v57 = vpop.f32.mrb[83].mxu1 }
 0x18b   : > { %v2630_v10 = vsel %vm2208_vm11, %v1555_v41, %v2419_v26  ;;  %3794 = vst.msk [vmem:[%s5272_s29 + $0x2ac] sm:$0xf] %vm3622_vm1, %v4497_v51  ;;  %v4392_v60 = vpack.c.bf16 %v2632_v62, %v2632_v62  ;;  %v1995_v52 = vadd.f32 %v5613_v17, %v5818_v50  ;;  %v1987_v63 = vadd.f32 %v5613_v17, %v5832_v34 }
 0x18c   : > { %v4390_v35 = vpack.c.bf16 %v2630_v10, %v2630_v10  ;;  %v2633_v27 = vsel %vm2211_vm12, %v1566_v30, %v2422_v39  ;;  %3792 = vst.msk [vmem:[%s5272_s29 + $0x2a4] sm:$0xf] %vm3622_vm1, %v4495_v12  ;;  %vm2209_vm13 = vcmp.ge.f32.partialorder %v1558_v53, 0.0  ;;  %v2420_v14 = vmul.f32 0.2, %v1558_v53 }
 0x18d   : > { %v4393_v1 = vpack.c.bf16 %v2633_v27, %v2633_v27  ;;  %3689 = vst.msk [vmem:[%s5272_s29 + $0x108] sm:$0xf] %vm3622_vm1, %v4392_v60  ;;  %vm2318_vm14 = vcmp.ge.f32.partialorder %v1995_v52, 0.0  ;;  %v2529_v28 = vmul.f32 0.2, %v1995_v52  ;;  %v1998_v15 = vadd.f32 %v5613_v17, %v5836_v7  ;;  %v6031_v30 = vpop.f32.mrb[84].mxu0 }
 0x18e   : > { %3687 = vst.msk [vmem:[%s5272_s29 + $0x100] sm:$0xf] %vm3622_vm1, %v4390_v35  ;;  %v1990_v50 = vadd.f32 %v5613_v17, %v5840_v0  ;;  %v2631_v2 = vsel %vm2209_vm13, %v1558_v53, %v2420_v14  ;;  %vm2316_vm15 = vcmp.ge.f32.partialorder %v1987_v63, 0.0  ;;  %v2527_v41 = vmul.f32 0.2, %v1987_v63  ;;  %v6033_v6 = vpop.f32.mrb[84].mxu1 }
 0x18f   : > { %3690 = vst.msk [vmem:[%s5272_s29 + $0x10c] sm:$0xf] %vm3622_vm1, %v4393_v1  ;;  %v1579_v34 = vadd.f32 %v5613_v17, %v5856_v48  ;;  %v4391_v37 = vpack.c.bf16 %v2631_v2, %v2631_v2  ;;  %v2740_v49 = vsel %vm2318_vm14, %v1995_v52, %v2529_v28  ;;  %vm2319_vm0 = vcmp.ge.f32.partialorder %v1998_v15, 0.0  ;;  %v6035_v22 = vpop.f32.mrb[85].mxu0  ;;  %v6037_v0 = vpop.f32.mrb[85].mxu1 }
 0x190   : > { %v2530_v7 = vmul.f32 0.2, %v1998_v15  ;;  %v4500_v29 = vpack.c.bf16 %v2740_v49, %v2740_v49  ;;  %v2738_v38 = vsel %vm2316_vm15, %v1987_v63, %v2527_v41  ;;  %vm2317_vm2 = vcmp.ge.f32.partialorder %v1990_v50, 0.0  ;;  %v6039_v26 = vpop.f32.mrb[86].mxu0  ;;  %v6041_v48 = vpop.f32.mrb[86].mxu1 }
 0x191   : > { %v2528_v3 = vmul.f32 0.2, %v1990_v50  ;;  %3688 = vst.msk [vmem:[%s5272_s29 + $0x104] sm:$0xf] %vm3622_vm1, %v4391_v37  ;;  %v4498_v51 = vpack.c.bf16 %v2738_v38, %v2738_v38  ;;  %vm2214_vm3 = vcmp.ge.f32.partialorder %v1579_v34, 0.0  ;;  %v6045_v12 = vpop.f32.mrb[87].mxu0  ;;  %v1571_v60 = vadd.f32 %v5613_v17, %v5868_v32 }
 0x192   : > { %v2741_v33 = vsel %vm2319_vm0, %v1998_v15, %v2530_v7  ;;  %v2425_v39 = vmul.f32 0.2, %v1579_v34  ;;  %v6047_v62 = vpop.f32.mrb[87].mxu1  ;;  %3797 = vst.msk [vmem:[%s5272_s29 + $0x2b8] sm:$0xf] %vm3622_vm1, %v4500_v29  ;;  %v1582_v35 = vadd.f32 %v5613_v17, %v5876_v36  ;;  %v1574_v1 = vadd.f32 %v5613_v17, %v5880_v55 }
 0x193   : > { %v4501_v10 = vpack.c.bf16 %v2741_v33, %v2741_v33  ;;  %v2739_v53 = vsel %vm2317_vm2, %v1990_v50, %v2528_v3  ;;  %3795 = vst.msk [vmem:[%s5272_s29 + $0x2b0] sm:$0xf] %vm3622_vm1, %v4498_v51  ;;  %v2011_v14 = vadd.f32 %v5613_v17, %v5858_v18  ;;  %vm2212_vm4 = vcmp.ge.f32.partialorder %v1571_v60, 0.0 }
 0x194   : > { %v4499_v27 = vpack.c.bf16 %v2739_v53, %v2739_v53  ;;  %v2636_v52 = vsel %vm2214_vm3, %v1579_v34, %v2425_v39  ;;  %v2423_v28 = vmul.f32 0.2, %v1571_v60  ;;  %vm2215_vm5 = vcmp.ge.f32.partialorder %v1582_v35, 0.0 }
 0x195   : > { %3798 = vst.msk [vmem:[%s5272_s29 + $0x2bc] sm:$0xf] %vm3622_vm1, %v4501_v10  ;;  %v4396_v63 = vpack.c.bf16 %v2636_v52, %v2636_v52  ;;  %v2426_v32 = vmul.f32 0.2, %v1582_v35  ;;  %vm2213_vm6 = vcmp.ge.f32.partialorder %v1574_v1, 0.0  ;;  %vm2322_vm7 = vcmp.ge.f32.partialorder %v2011_v14, 0.0 }
 0x196   : > { %3796 = vst.msk [vmem:[%s5272_s29 + $0x2b4] sm:$0xf] %vm3622_vm1, %v4499_v27  ;;  %v2424_v36 = vmul.f32 0.2, %v1574_v1  ;;  %v2634_v15 = vsel %vm2212_vm4, %v1571_v60, %v2423_v28  ;;  %v2533_v50 = vmul.f32 0.2, %v2011_v14  ;;  %v2003_v55 = vadd.f32 %v5613_v17, %v5870_v4 }
 0x197   : > { %3693 = vst.msk [vmem:[%s5272_s29 + $0x118] sm:$0xf] %vm3622_vm1, %v4396_v63  ;;  %v2014_v18 = vadd.f32 %v5613_v17, %v5878_v56  ;;  %v6071_v2 = vpop.f32.mrb[88].mxu0  ;;  %v6073_v41 = vpop.f32.mrb[88].mxu1  ;;  %v4394_v34 = vpack.c.bf16 %v2634_v15, %v2634_v15  ;;  %v2637_v37 = vsel %vm2215_vm5, %v1582_v35, %v2426_v32  ;;  %v2006_v7 = vadd.f32 %v5613_v17, %v5882_v31  ;;  %v6097_v60 = vld [vmem:[%s6438_s2] ss:$0 sm:$0xff] }
 0x198   : > { %v2635_v49 = vsel %vm2213_vm6, %v1574_v1, %v2424_v36  ;;  %v6077_v29 = vpop.f32.mrb[89].mxu0  ;;  %v6079_v38 = vpop.f32.mrb[89].mxu1  ;;  %v4397_v4 = vpack.c.bf16 %v2637_v37, %v2637_v37  ;;  %v2744_v56 = vsel %vm2322_vm7, %v2011_v14, %v2533_v50  ;;  %vm2320_vm8 = vcmp.ge.f32.partialorder %v2003_v55, 0.0 }
 0x199   : > { %v4395_v3 = vpack.c.bf16 %v2635_v49, %v2635_v49  ;;  %v6082_v51 = vpop.f32.mrb[90].mxu0  ;;  %v6084_v33 = vpop.f32.mrb[90].mxu1  ;;  %3691 = vst.msk [vmem:[%s5272_s29 + $0x110] sm:$0xf] %vm3622_vm1, %v4394_v34  ;;  %v4504_v39 = vpack.c.bf16 %v2744_v56, %v2744_v56  ;;  %v2531_v10 = vmul.f32 0.2, %v2003_v55  ;;  %v1595_v35 = vadd.f32 %v6097_v60, %v5900_v40 }
 0x19a   : > { %vm2323_vm9 = vcmp.ge.f32.partialorder %v2014_v18, 0.0  ;;  %v2534_v17 = vmul.f32 0.2, %v2014_v18  ;;  %v6088_v31 = vpop.f32.mrb[91].mxu0  ;;  %3694 = vst.msk [vmem:[%s5272_s29 + $0x11c] sm:$0xf] %vm3622_vm1, %v4397_v4  ;;  %v1587_v27 = vadd.f32 %v6097_v60, %v5912_v25  ;;  %v1598_v63 = vadd.f32 %v6097_v60, %v5919_v42 }
 0x19b   : > { %3692 = vst.msk [vmem:[%s5272_s29 + $0x114] sm:$0xf] %vm3622_vm1, %v4395_v3  ;;  %vm2321_vm10 = vcmp.ge.f32.partialorder %v2006_v7, 0.0  ;;  %v2532_v53 = vmul.f32 0.2, %v2006_v7  ;;  %v6103_v52 = vpop.f32.mrb[91].mxu1  ;;  %v2742_v1 = vsel %vm2320_vm8, %v2003_v55, %v2531_v10  ;;  %v1590_v28 = vadd.f32 %v6097_v60, %v5924_v13 }
 0x19c   : > { %3801 = vst.msk [vmem:[%s5272_s29 + $0x2c8] sm:$0xf] %vm3622_vm1, %v4504_v39  ;;  %v2745_v14 = vsel %vm2323_vm9, %v2014_v18, %v2534_v17  ;;  %v4502_v40 = vpack.c.bf16 %v2742_v1, %v2742_v1  ;;  %vm2218_vm11 = vcmp.ge.f32.partialorder %v1595_v35, 0.0  ;;  %v2429_v15 = vmul.f32 0.2, %v1595_v35 }
 0x19d   : > { %v4505_v32 = vpack.c.bf16 %v2745_v14, %v2745_v14  ;;  %v2743_v36 = vsel %vm2321_vm10, %v2006_v7, %v2532_v53  ;;  %vm2216_vm12 = vcmp.ge.f32.partialorder %v1587_v27, 0.0  ;;  %v2427_v50 = vmul.f32 0.2, %v1587_v27  ;;  %v6122_v49 = vpop.f32.mrb[92].mxu0  ;;  %v6124_v7 = vpop.f32.mrb[92].mxu1 }
 0x19e   : > { %v4503_v25 = vpack.c.bf16 %v2743_v36, %v2743_v36  ;;  %3799 = vst.msk [vmem:[%s5272_s29 + $0x2c0] sm:$0xf] %vm3622_vm1, %v4502_v40  ;;  %vm2219_vm13 = vcmp.ge.f32.partialorder %v1598_v63, 0.0  ;;  %v2430_v55 = vmul.f32 0.2, %v1598_v63  ;;  %vm2217_vm14 = vcmp.ge.f32.partialorder %v1590_v28, 0.0 }
 0x19f   : > { %3802 = vst.msk [vmem:[%s5272_s29 + $0x2cc] sm:$0xf] %vm3622_vm1, %v4505_v32  ;;  %v2428_v42 = vmul.f32 0.2, %v1590_v28  ;;  %v2640_v18 = vsel %vm2218_vm11, %v1595_v35, %v2429_v15  ;;  %v2638_v13 = vsel %vm2216_vm12, %v1587_v27, %v2427_v50  ;;  %v2027_v34 = vadd.f32 %v6097_v60, %v5902_v45  ;;  %v6126_v10 = vpop.f32.mrb[93].mxu0  ;;  %v6128_v17 = vpop.f32.mrb[93].mxu1 }
 0x1a0   : > { %3800 = vst.msk [vmem:[%s5272_s29 + $0x2c4] sm:$0xf] %vm3622_vm1, %v4503_v25  ;;  %v2019_v37 = vadd.f32 %v6097_v60, %v5914_v59  ;;  %v4400_v4 = vpack.c.bf16 %v2640_v18, %v2640_v18  ;;  %v4398_v3 = vpack.c.bf16 %v2638_v13, %v2638_v13  ;;  %v2641_v56 = vsel %vm2219_vm13, %v1598_v63, %v2430_v55  ;;  %v6130_v59 = vpop.f32.mrb[94].mxu0  ;;  %v6132_v27 = vpop.f32.mrb[94].mxu1 }
 0x1a1   : > { %v2639_v39 = vsel %vm2217_vm14, %v1590_v28, %v2428_v42  ;;  %v4401_v45 = vpack.c.bf16 %v2641_v56, %v2641_v56  ;;  %vm2326_vm15 = vcmp.ge.f32.partialorder %v2027_v34, 0.0  ;;  %v2537_v35 = vmul.f32 0.2, %v2027_v34  ;;  %v6142_v28 = vpop.f32.mrb[95].mxu0  ;;  %v6144_v40 = vpop.f32.mrb[95].mxu1 }
 0x1a2   : > { %v4399_v53 = vpack.c.bf16 %v2639_v39, %v2639_v39  ;;  %3697 = vst.msk [vmem:[%s5272_s29 + $0x128] sm:$0xf] %vm3622_vm1, %v4400_v4  ;;  %3695 = vst.msk [vmem:[%s5272_s29 + $0x120] sm:$0xf] %vm3622_vm1, %v4398_v3  ;;  %vm2324_vm0 = vcmp.ge.f32.partialorder %v2019_v37, 0.0  ;;  %v2030_v14 = vadd.f32 %v6097_v60, %v5921_v19  ;;  %v2022_v63 = vadd.f32 %v6097_v60, %v5926_v11 }
 0x1a3   : > { %v2535_v1 = vmul.f32 0.2, %v2019_v37  ;;  %3698 = vst.msk [vmem:[%s5272_s29 + $0x12c] sm:$0xf] %vm3622_vm1, %v4401_v45  ;;  %v2748_v32 = vsel %vm2326_vm15, %v2027_v34, %v2537_v35  ;;  %v1611_v36 = vadd.f32 %v6097_v60, %v5944_v61  ;;  %v1603_v25 = vadd.f32 %v6097_v60, %v5948_v24 }
 0x1a4   : > { %3696 = vst.msk [vmem:[%s5272_s29 + $0x124] sm:$0xf] %vm3622_vm1, %v4399_v53  ;;  %v1614_v19 = vadd.f32 %v6097_v60, %v5960_v46  ;;  %v4508_v11 = vpack.c.bf16 %v2748_v32, %v2748_v32  ;;  %vm2327_vm2 = vcmp.ge.f32.partialorder %v2030_v14, 0.0  ;;  %v2538_v50 = vmul.f32 0.2, %v2030_v14 }
 0x1a5   : > { %v2746_v15 = vsel %vm2324_vm0, %v2019_v37, %v2535_v1  ;;  %vm2325_vm3 = vcmp.ge.f32.partialorder %v2022_v63, 0.0  ;;  %v2536_v42 = vmul.f32 0.2, %v2022_v63  ;;  %vm2222_vm4 = vcmp.ge.f32.partialorder %v1611_v36, 0.0  ;;  %v6158_v24 = vpop.f32.mrb[96].mxu0  ;;  %v6164_v3 = vpop.f32.mrb[96].mxu1 }
 0x1a6   : > { %v4506_v55 = vpack.c.bf16 %v2746_v15, %v2746_v15  ;;  %3805 = vst.msk [vmem:[%s5272_s29 + $0x2d8] sm:$0xf] %vm3622_vm1, %v4508_v11  ;;  %v2749_v18 = vsel %vm2327_vm2, %v2030_v14, %v2538_v50  ;;  %v2433_v13 = vmul.f32 0.2, %v1611_v36  ;;  %vm2220_vm5 = vcmp.ge.f32.partialorder %v1603_v25, 0.0  ;;  %v6162_v4 = vpop.f32.mrb[97].mxu0 }
 0x1a7   : > { %v2431_v61 = vmul.f32 0.2, %v1603_v25  ;;  %v4509_v46 = vpack.c.bf16 %v2749_v18, %v2749_v18  ;;  %v2747_v34 = vsel %vm2325_vm3, %v2022_v63, %v2536_v42  ;;  %vm2223_vm6 = vcmp.ge.f32.partialorder %v1614_v19, 0.0  ;;  %v6168_v35 = vpop.f32.mrb[98].mxu0  ;;  %v6170_v1 = vpop.f32.mrb[97].mxu1 }
 0x1a8   : > { %3803 = vst.msk [vmem:[%s5272_s29 + $0x2d0] sm:$0xf] %vm3622_vm1, %v4506_v55  ;;  %v2434_v37 = vmul.f32 0.2, %v1614_v19  ;;  %v4507_v56 = vpack.c.bf16 %v2747_v34, %v2747_v34  ;;  %v2644_v39 = vsel %vm2222_vm4, %v1611_v36, %v2433_v13  ;;  %v1606_v53 = vadd.f32 %v6097_v60, %v5964_v58  ;;  %v6176_v36 = vpop.f32.mrb[99].mxu0 }
 0x1a9   : > { %v2642_v45 = vsel %vm2220_vm5, %v1603_v25, %v2431_v61  ;;  %3806 = vst.msk [vmem:[%s5272_s29 + $0x2dc] sm:$0xf] %vm3622_vm1, %v4509_v46  ;;  %v4404_v14 = vpack.c.bf16 %v2644_v39, %v2644_v39  ;;  %v2043_v11 = vadd.f32 %v6097_v60, %v5946_v21  ;;  %v6178_v25 = vpop.f32.mrb[98].mxu1  ;;  %v2035_v50 = vadd.f32 %v6097_v60, %v5962_v5 }
 0x1aa   : > { %v4402_v63 = vpack.c.bf16 %v2642_v45, %v2642_v45  ;;  %v2645_v32 = vsel %vm2223_vm6, %v1614_v19, %v2434_v37  ;;  %3804 = vst.msk [vmem:[%s5272_s29 + $0x2d4] sm:$0xf] %vm3622_vm1, %v4507_v56  ;;  %vm2221_vm7 = vcmp.ge.f32.partialorder %v1606_v53, 0.0  ;;  %v2432_v15 = vmul.f32 0.2, %v1606_v53  ;;  %v6184_v55 = vpop.f32.mrb[99].mxu1 }
 0x1ab   : > { %v4405_v58 = vpack.c.bf16 %v2645_v32, %v2645_v32  ;;  %3701 = vst.msk [vmem:[%s5272_s29 + $0x138] sm:$0xf] %vm3622_vm1, %v4404_v14  ;;  %vm2330_vm8 = vcmp.ge.f32.partialorder %v2043_v11, 0.0  ;;  %v2541_v21 = vmul.f32 0.2, %v2043_v11  ;;  %v2046_v19 = vadd.f32 %v6097_v60, %v5966_v23 }
 0x1ac   : > { %3699 = vst.msk [vmem:[%s5272_s29 + $0x130] sm:$0xf] %vm3622_vm1, %v4402_v63  ;;  %v2038_v42 = vadd.f32 %v6097_v60, %v5968_v44  ;;  %v2643_v18 = vsel %vm2221_vm7, %v1606_v53, %v2432_v15  ;;  %vm2328_vm9 = vcmp.ge.f32.partialorder %v2035_v50, 0.0  ;;  %v2539_v5 = vmul.f32 0.2, %v2035_v50 }
 0x1ad   : > { %3702 = vst.msk [vmem:[%s5272_s29 + $0x13c] sm:$0xf] %vm3622_vm1, %v4405_v58  ;;  %v1627_v13 = vadd.f32 %v6097_v60, %v5988_v20  ;;  %v4403_v61 = vpack.c.bf16 %v2643_v18, %v2643_v18  ;;  %v2752_v46 = vsel %vm2330_vm8, %v2043_v11, %v2541_v21  ;;  %vm2331_vm10 = vcmp.ge.f32.partialorder %v2046_v19, 0.0  ;;  %v6198_v39 = vpop.f32.mrb[100].mxu0  ;;  %v6200_v44 = vpop.f32.mrb[100].mxu1 }
 0x1ae   : > { %v2542_v34 = vmul.f32 0.2, %v2046_v19  ;;  %v4512_v37 = vpack.c.bf16 %v2752_v46, %v2752_v46  ;;  %v2750_v56 = vsel %vm2328_vm9, %v2035_v50, %v2539_v5  ;;  %vm2329_vm11 = vcmp.ge.f32.partialorder %v2038_v42, 0.0  ;;  %v6204_v14 = vpop.f32.mrb[101].mxu0  ;;  %v6206_v63 = vpop.f32.mrb[101].mxu1 }
 0x1af   : > { %v2540_v23 = vmul.f32 0.2, %v2038_v42  ;;  %3700 = vst.msk [vmem:[%s5272_s29 + $0x134] sm:$0xf] %vm3622_vm1, %v4403_v61  ;;  %v4510_v45 = vpack.c.bf16 %v2750_v56, %v2750_v56  ;;  %vm2226_vm12 = vcmp.ge.f32.partialorder %v1627_v13, 0.0  ;;  %v1619_v58 = vadd.f32 %v6097_v60, %v5992_v8  ;;  %v6214_v50 = vpop.f32.mrb[102].mxu0 }
 0x1b0   : > { %v2753_v53 = vsel %vm2331_vm10, %v2046_v19, %v2542_v34  ;;  %v2437_v20 = vmul.f32 0.2, %v1627_v13  ;;  %3809 = vst.msk [vmem:[%s5272_s29 + $0x2e8] sm:$0xf] %vm3622_vm1, %v4512_v37  ;;  %v1630_v15 = vadd.f32 %v6097_v60, %v5998_v47  ;;  %v4863_v21 = vpop.f32.mrb[102].mxu1  ;;  %v1622_v5 = vadd.f32 %v6097_v60, %v6002_v54  ;;  %v6222_v61 = vpop.f32.mrb[103].mxu0 }
 0x1b1   : > { %v4513_v32 = vpack.c.bf16 %v2753_v53, %v2753_v53  ;;  %v2751_v11 = vsel %vm2329_vm11, %v2038_v42, %v2540_v23  ;;  %3807 = vst.msk [vmem:[%s5272_s29 + $0x2e0] sm:$0xf] %vm3622_vm1, %v4510_v45  ;;  %v2059_v42 = vadd.f32 %v6097_v60, %v5990_v43  ;;  %v6224_v8 = vpop.f32.mrb[103].mxu1  ;;  %vm2224_vm13 = vcmp.ge.f32.partialorder %v1619_v58, 0.0 }
 0x1b2   : > { %v4511_v19 = vpack.c.bf16 %v2751_v11, %v2751_v11  ;;  %v2648_v18 = vsel %vm2226_vm12, %v1627_v13, %v2437_v20  ;;  %v2435_v46 = vmul.f32 0.2, %v1619_v58  ;;  %vm2227_vm14 = vcmp.ge.f32.partialorder %v1630_v15, 0.0 }
 0x1b3   : > { %3810 = vst.msk [vmem:[%s5272_s29 + $0x2ec] sm:$0xf] %vm3622_vm1, %v4513_v32  ;;  %v4408_v47 = vpack.c.bf16 %v2648_v18, %v2648_v18  ;;  %v2438_v34 = vmul.f32 0.2, %v1630_v15  ;;  %vm2225_vm15 = vcmp.ge.f32.partialorder %v1622_v5, 0.0  ;;  %vm2334_vm0 = vcmp.ge.f32.partialorder %v2059_v42, 0.0 }
 0x1b4   : > { %3808 = vst.msk [vmem:[%s5272_s29 + $0x2e4] sm:$0xf] %vm3622_vm1, %v4511_v19  ;;  %v2436_v13 = vmul.f32 0.2, %v1622_v5  ;;  %v2646_v43 = vsel %vm2224_vm13, %v1619_v58, %v2435_v46  ;;  %v2545_v54 = vmul.f32 0.2, %v2059_v42  ;;  %v2051_v37 = vadd.f32 %v6097_v60, %v5994_v16 }
 0x1b5   : > { %3705 = vst.msk [vmem:[%s5272_s29 + $0x148] sm:$0xf] %vm3622_vm1, %v4408_v47  ;;  %v2062_v56 = vadd.f32 %v6097_v60, %v6004_v9  ;;  %v4406_v23 = vpack.c.bf16 %v2646_v43, %v2646_v43  ;;  %v2649_v45 = vsel %vm2227_vm14, %v1630_v15, %v2438_v34  ;;  %v2054_v20 = vadd.f32 %v6097_v60, %v6009_v57  ;;  %v6238_v58 = vpop.f32.mrb[104].mxu0 }
 0x1b6   : > { %v2647_v53 = vsel %vm2225_vm15, %v1622_v5, %v2436_v13  ;;  %v4409_v32 = vpack.c.bf16 %v2649_v45, %v2649_v45  ;;  %v2756_v21 = vsel %vm2334_vm0, %v2059_v42, %v2545_v54  ;;  %vm2332_vm2 = vcmp.ge.f32.partialorder %v2051_v37, 0.0  ;;  %v6242_v18 = vpop.f32.mrb[105].mxu0 }
 0x1b7   : > { %v4407_v11 = vpack.c.bf16 %v2647_v53, %v2647_v53  ;;  %3703 = vst.msk [vmem:[%s5272_s29 + $0x140] sm:$0xf] %vm3622_vm1, %v4406_v23  ;;  %v4516_v16 = vpack.c.bf16 %v2756_v21, %v2756_v21  ;;  %v2543_v19 = vmul.f32 0.2, %v2051_v37  ;;  %vm2335_vm3 = vcmp.ge.f32.partialorder %v2062_v56, 0.0  ;;  %v6252_v42 = vpop.f32.mrb[106].mxu0 }
 0x1b8   : > { %v2546_v9 = vmul.f32 0.2, %v2062_v56  ;;  %3706 = vst.msk [vmem:[%s5272_s29 + $0x14c] sm:$0xf] %vm3622_vm1, %v4409_v32  ;;  %vm2333_vm4 = vcmp.ge.f32.partialorder %v2054_v20, 0.0  ;;  %v1643_v15 = vadd.f32 %v6097_v60, %v6031_v30  ;;  %v1635_v5 = vadd.f32 %v6097_v60, %v6035_v22  ;;  %v6261_v30 = vpop.f32.mrb[107].mxu0 }
 0x1b9   : > { %3704 = vst.msk [vmem:[%s5272_s29 + $0x144] sm:$0xf] %vm3622_vm1, %v4407_v11  ;;  %v2544_v57 = vmul.f32 0.2, %v2054_v20  ;;  %3813 = vst.msk [vmem:[%s5272_s29 + $0x2f8] sm:$0xf] %vm3622_vm1, %v4516_v16  ;;  %v2754_v47 = vsel %vm2332_vm2, %v2051_v37, %v2543_v19  ;;  %v1646_v34 = vadd.f32 %v6097_v60, %v6039_v26  ;;  %v1638_v13 = vadd.f32 %v6097_v60, %v6045_v12 }
 0x1ba   : > { %v2757_v46 = vsel %vm2335_vm3, %v2062_v56, %v2546_v9  ;;  %v4514_v43 = vpack.c.bf16 %v2754_v47, %v2754_v47  ;;  %vm2230_vm5 = vcmp.ge.f32.partialorder %v1643_v15, 0.0  ;;  %v2441_v45 = vmul.f32 0.2, %v1643_v15 }
 0x1bb   : > { %v4517_v22 = vpack.c.bf16 %v2757_v46, %v2757_v46  ;;  %v2755_v54 = vsel %vm2333_vm4, %v2054_v20, %v2544_v57  ;;  %vm2228_vm6 = vcmp.ge.f32.partialorder %v1635_v5, 0.0  ;;  %v2439_v53 = vmul.f32 0.2, %v1635_v5 }
 0x1bc   : > { %v4515_v23 = vpack.c.bf16 %v2755_v54, %v2755_v54  ;;  %3811 = vst.msk [vmem:[%s5272_s29 + $0x2f0] sm:$0xf] %vm3622_vm1, %v4514_v43  ;;  %vm2231_vm7 = vcmp.ge.f32.partialorder %v1646_v34, 0.0  ;;  %v2442_v26 = vmul.f32 0.2, %v1646_v34  ;;  %vm2229_vm8 = vcmp.ge.f32.partialorder %v1638_v13, 0.0 }
 0x1bd   : > { %3814 = vst.msk [vmem:[%s5272_s29 + $0x2fc] sm:$0xf] %vm3622_vm1, %v4517_v22  ;;  %v2440_v12 = vmul.f32 0.2, %v1638_v13  ;;  %v2652_v37 = vsel %vm2230_vm5, %v1643_v15, %v2441_v45  ;;  %v2650_v56 = vsel %vm2228_vm6, %v1635_v5, %v2439_v53  ;;  %v2075_v20 = vadd.f32 %v6097_v60, %v6033_v6 }
 0x1be   : > { %3812 = vst.msk [vmem:[%s5272_s29 + $0x2f4] sm:$0xf] %vm3622_vm1, %v4515_v23  ;;  %v2067_v32 = vadd.f32 %v6097_v60, %v6037_v0  ;;  %v4412_v11 = vpack.c.bf16 %v2652_v37, %v2652_v37  ;;  %v4410_v21 = vpack.c.bf16 %v2650_v56, %v2650_v56  ;;  %v2653_v16 = vsel %vm2231_vm7, %v1646_v34, %v2442_v26 }
 0x1bf   : > { %v2651_v19 = vsel %vm2229_vm8, %v1638_v13, %v2440_v12  ;;  %v4413_v9 = vpack.c.bf16 %v2653_v16, %v2653_v16  ;;  %vm2338_vm9 = vcmp.ge.f32.partialorder %v2075_v20, 0.0  ;;  %v2549_v47 = vmul.f32 0.2, %v2075_v20 }
 0x1c0   : > { %v4411_v57 = vpack.c.bf16 %v2651_v19, %v2651_v19  ;;  %3709 = vst.msk [vmem:[%s5272_s29 + $0x158] sm:$0xf] %vm3622_vm1, %v4412_v11  ;;  %3707 = vst.msk [vmem:[%s5272_s29 + $0x150] sm:$0xf] %vm3622_vm1, %v4410_v21  ;;  %vm2336_vm10 = vcmp.ge.f32.partialorder %v2067_v32, 0.0  ;;  %v2078_v6 = vadd.f32 %v6097_v60, %v6041_v48  ;;  %v2070_v0 = vadd.f32 %v6097_v60, %v6047_v62 }
 0x1c1   : > { %v2547_v15 = vmul.f32 0.2, %v2067_v32  ;;  %3710 = vst.msk [vmem:[%s5272_s29 + $0x15c] sm:$0xf] %vm3622_vm1, %v4413_v9  ;;  %v2760_v5 = vsel %vm2338_vm9, %v2075_v20, %v2549_v47  ;;  %v1659_v46 = vadd.f32 %v6097_v60, %v6071_v2  ;;  %v1651_v34 = vadd.f32 %v6097_v60, %v6077_v29 }
 0x1c2   : > { %3708 = vst.msk [vmem:[%s5272_s29 + $0x154] sm:$0xf] %vm3622_vm1, %v4411_v57  ;;  %v1662_v13 = vadd.f32 %v6097_v60, %v6082_v51  ;;  %v4520_v48 = vpack.c.bf16 %v2760_v5, %v2760_v5  ;;  %vm2339_vm11 = vcmp.ge.f32.partialorder %v2078_v6, 0.0  ;;  %v2550_v22 = vmul.f32 0.2, %v2078_v6 }
 0x1c3   : > { %v2758_v43 = vsel %vm2336_vm10, %v2067_v32, %v2547_v15  ;;  %vm2337_vm12 = vcmp.ge.f32.partialorder %v2070_v0, 0.0  ;;  %v2548_v54 = vmul.f32 0.2, %v2070_v0  ;;  %vm2234_vm13 = vcmp.ge.f32.partialorder %v1659_v46, 0.0 }
 0x1c4   : > { %v4518_v62 = vpack.c.bf16 %v2758_v43, %v2758_v43  ;;  %3817 = vst.msk [vmem:[%s5272_s29 + $0x308] sm:$0xf] %vm3622_vm1, %v4520_v48  ;;  %v2761_v23 = vsel %vm2339_vm11, %v2078_v6, %v2550_v22  ;;  %v2445_v2 = vmul.f32 0.2, %v1659_v46  ;;  %vm2232_vm14 = vcmp.ge.f32.partialorder %v1651_v34, 0.0 }
 0x1c5   : > { %v2443_v45 = vmul.f32 0.2, %v1651_v34  ;;  %v4521_v29 = vpack.c.bf16 %v2761_v23, %v2761_v23  ;;  %v2759_v51 = vsel %vm2337_vm12, %v2070_v0, %v2548_v54  ;;  %vm2235_vm15 = vcmp.ge.f32.partialorder %v1662_v13, 0.0 }
 0x1c6   : > { %3815 = vst.msk [vmem:[%s5272_s29 + $0x300] sm:$0xf] %vm3622_vm1, %v4518_v62  ;;  %v2446_v53 = vmul.f32 0.2, %v1662_v13  ;;  %v4519_v26 = vpack.c.bf16 %v2759_v51, %v2759_v51  ;;  %v2656_v12 = vsel %vm2234_vm13, %v1659_v46, %v2445_v2  ;;  %v1654_v56 = vadd.f32 %v6097_v60, %v6088_v31 }
 0x1c7   : > { %v2654_v37 = vsel %vm2232_vm14, %v1651_v34, %v2443_v45  ;;  %3818 = vst.msk [vmem:[%s5272_s29 + $0x30c] sm:$0xf] %vm3622_vm1, %v4521_v29  ;;  %v4416_v20 = vpack.c.bf16 %v2656_v12, %v2656_v12  ;;  %v2091_v21 = vadd.f32 %v6097_v60, %v6073_v41  ;;  %v2083_v9 = vadd.f32 %v6097_v60, %v6079_v38 }
 0x1c8   : > { %v4414_v32 = vpack.c.bf16 %v2654_v37, %v2654_v37  ;;  %v2657_v11 = vsel %vm2235_vm15, %v1662_v13, %v2446_v53  ;;  %3816 = vst.msk [vmem:[%s5272_s29 + $0x304] sm:$0xf] %vm3622_vm1, %v4519_v26  ;;  %vm2233_vm0 = vcmp.ge.f32.partialorder %v1654_v56, 0.0  ;;  %v2444_v19 = vmul.f32 0.2, %v1654_v56 }
 0x1c9   : > { %v4417_v16 = vpack.c.bf16 %v2657_v11, %v2657_v11  ;;  %3713 = vst.msk [vmem:[%s5272_s29 + $0x168] sm:$0xf] %vm3622_vm1, %v4416_v20  ;;  %vm2342_vm2 = vcmp.ge.f32.partialorder %v2091_v21, 0.0  ;;  %v2553_v31 = vmul.f32 0.2, %v2091_v21  ;;  %v2094_v57 = vadd.f32 %v6097_v60, %v6084_v33 }
 0x1ca   : > { %3711 = vst.msk [vmem:[%s5272_s29 + $0x160] sm:$0xf] %vm3622_vm1, %v4414_v32  ;;  %v2086_v41 = vadd.f32 %v6097_v60, %v6103_v52  ;;  %v2655_v47 = vsel %vm2233_vm0, %v1654_v56, %v2444_v19  ;;  %vm2340_vm3 = vcmp.ge.f32.partialorder %v2083_v9, 0.0  ;;  %v2551_v15 = vmul.f32 0.2, %v2083_v9 }
 0x1cb   : > { %3714 = vst.msk [vmem:[%s5272_s29 + $0x16c] sm:$0xf] %vm3622_vm1, %v4417_v16  ;;  %v1675_v38 = vadd.f32 %v6097_v60, %v6122_v49  ;;  %v4415_v6 = vpack.c.bf16 %v2655_v47, %v2655_v47  ;;  %v2764_v0 = vsel %vm2342_vm2, %v2091_v21, %v2553_v31  ;;  %vm2343_vm4 = vcmp.ge.f32.partialorder %v2094_v57, 0.0 }
 0x1cc   : > { %v2554_v5 = vmul.f32 0.2, %v2094_v57  ;;  %v4524_v46 = vpack.c.bf16 %v2764_v0, %v2764_v0  ;;  %v2762_v34 = vsel %vm2340_vm3, %v2083_v9, %v2551_v15  ;;  %vm2341_vm5 = vcmp.ge.f32.partialorder %v2086_v41, 0.0 }
 0x1cd   : > { %v2552_v33 = vmul.f32 0.2, %v2086_v41  ;;  %3712 = vst.msk [vmem:[%s5272_s29 + $0x164] sm:$0xf] %vm3622_vm1, %v4415_v6  ;;  %v4522_v52 = vpack.c.bf16 %v2762_v34, %v2762_v34  ;;  %vm2238_vm6 = vcmp.ge.f32.partialorder %v1675_v38, 0.0  ;;  %v1667_v22 = vadd.f32 %v6097_v60, %v6126_v10 }
 0x1ce   : > { %v2765_v13 = vsel %vm2343_vm4, %v2094_v57, %v2554_v5  ;;  %v2449_v48 = vmul.f32 0.2, %v1675_v38  ;;  %3821 = vst.msk [vmem:[%s5272_s29 + $0x318] sm:$0xf] %vm3622_vm1, %v4524_v46  ;;  %v1678_v62 = vadd.f32 %v6097_v60, %v6130_v59  ;;  %v1670_v2 = vadd.f32 %v6097_v60, %v6142_v28 }
 0x1cf   : > { %v4525_v49 = vpack.c.bf16 %v2765_v13, %v2765_v13  ;;  %v2763_v43 = vsel %vm2341_vm5, %v2086_v41, %v2552_v33  ;;  %3819 = vst.msk [vmem:[%s5272_s29 + $0x310] sm:$0xf] %vm3622_vm1, %v4522_v52  ;;  %v2107_v45 = vadd.f32 %v6097_v60, %v6124_v7  ;;  %vm2236_vm7 = vcmp.ge.f32.partialorder %v1667_v22, 0.0 }
 0x1d0   : > { %v4523_v54 = vpack.c.bf16 %v2763_v43, %v2763_v43  ;;  %v2660_v23 = vsel %vm2238_vm6, %v1675_v38, %v2449_v48  ;;  %v2447_v51 = vmul.f32 0.2, %v1667_v22  ;;  %vm2239_vm8 = vcmp.ge.f32.partialorder %v1678_v62, 0.0 }
 0x1d1   : > { %3822 = vst.msk [vmem:[%s5272_s29 + $0x31c] sm:$0xf] %vm3622_vm1, %v4525_v49  ;;  %v4420_v29 = vpack.c.bf16 %v2660_v23, %v2660_v23  ;;  %v2450_v10 = vmul.f32 0.2, %v1678_v62  ;;  %vm2237_vm9 = vcmp.ge.f32.partialorder %v1670_v2, 0.0  ;;  %vm2346_vm10 = vcmp.ge.f32.partialorder %v2107_v45, 0.0 }
 0x1d2   : > { %3820 = vst.msk [vmem:[%s5272_s29 + $0x314] sm:$0xf] %vm3622_vm1, %v4523_v54  ;;  %v2448_v59 = vmul.f32 0.2, %v1670_v2  ;;  %v2658_v53 = vsel %vm2236_vm7, %v1667_v22, %v2447_v51  ;;  %v2557_v28 = vmul.f32 0.2, %v2107_v45  ;;  %v2099_v7 = vadd.f32 %v6097_v60, %v6128_v17 }
 0x1d3   : > { %3717 = vst.msk [vmem:[%s5272_s29 + $0x178] sm:$0xf] %vm3622_vm1, %v4420_v29  ;;  %v2110_v26 = vadd.f32 %v6097_v60, %v6132_v27  ;;  %v4418_v12 = vpack.c.bf16 %v2658_v53, %v2658_v53  ;;  %v2661_v37 = vsel %vm2239_vm8, %v1678_v62, %v2450_v10  ;;  %v2102_v20 = vadd.f32 %v6097_v60, %v6144_v40 }
 0x1d4   : > { %v2659_v56 = vsel %vm2237_vm9, %v1670_v2, %v2448_v59  ;;  %v4421_v32 = vpack.c.bf16 %v2661_v37, %v2661_v37  ;;  %v2768_v21 = vsel %vm2346_vm10, %v2107_v45, %v2557_v28  ;;  %vm2344_vm11 = vcmp.ge.f32.partialorder %v2099_v7, 0.0 }
 0x1d5   : > { %v4419_v11 = vpack.c.bf16 %v2659_v56, %v2659_v56  ;;  %3715 = vst.msk [vmem:[%s5272_s29 + $0x170] sm:$0xf] %vm3622_vm1, %v4418_v12  ;;  %v4528_v16 = vpack.c.bf16 %v2768_v21, %v2768_v21  ;;  %v2555_v19 = vmul.f32 0.2, %v2099_v7  ;;  %vm2347_vm12 = vcmp.ge.f32.partialorder %v2110_v26, 0.0 }
 0x1d6   : > { %v2558_v17 = vmul.f32 0.2, %v2110_v26  ;;  %3718 = vst.msk [vmem:[%s5272_s29 + $0x17c] sm:$0xf] %vm3622_vm1, %v4421_v32  ;;  %vm2345_vm13 = vcmp.ge.f32.partialorder %v2102_v20, 0.0  ;;  %v1691_v40 = vadd.f32 %v6097_v60, %v6158_v24  ;;  %v1683_v9 = vadd.f32 %v6097_v60, %v6162_v4 }
 0x1d7   : > { %3716 = vst.msk [vmem:[%s5272_s29 + $0x174] sm:$0xf] %vm3622_vm1, %v4419_v11  ;;  %v2556_v27 = vmul.f32 0.2, %v2102_v20  ;;  %3825 = vst.msk [vmem:[%s5272_s29 + $0x328] sm:$0xf] %vm3622_vm1, %v4528_v16  ;;  %v2766_v31 = vsel %vm2344_vm11, %v2099_v7, %v2555_v19  ;;  %v1694_v41 = vadd.f32 %v6097_v60, %v6168_v35  ;;  %v1686_v47 = vadd.f32 %v6097_v60, %v6176_v36 }
 0x1d8   : > { %v2769_v57 = vsel %vm2347_vm12, %v2110_v26, %v2558_v17  ;;  %v4526_v15 = vpack.c.bf16 %v2766_v31, %v2766_v31  ;;  %vm2242_vm14 = vcmp.ge.f32.partialorder %v1691_v40, 0.0  ;;  %v2453_v0 = vmul.f32 0.2, %v1691_v40 }
 0x1d9   : > { %v4529_v38 = vpack.c.bf16 %v2769_v57, %v2769_v57  ;;  %v2767_v6 = vsel %vm2345_vm13, %v2102_v20, %v2556_v27  ;;  %vm2240_vm15 = vcmp.ge.f32.partialorder %v1683_v9, 0.0  ;;  %v2451_v5 = vmul.f32 0.2, %v1683_v9 }
 0x1da   : > { %v4527_v24 = vpack.c.bf16 %v2767_v6, %v2767_v6  ;;  %3823 = vst.msk [vmem:[%s5272_s29 + $0x320] sm:$0xf] %vm3622_vm1, %v4526_v15  ;;  %vm2243_vm0 = vcmp.ge.f32.partialorder %v1694_v41, 0.0  ;;  %v2454_v4 = vmul.f32 0.2, %v1694_v41  ;;  %vm2241_vm2 = vcmp.ge.f32.partialorder %v1686_v47, 0.0 }
 0x1db   : > { %3826 = vst.msk [vmem:[%s5272_s29 + $0x32c] sm:$0xf] %vm3622_vm1, %v4529_v38  ;;  %v2452_v35 = vmul.f32 0.2, %v1686_v47  ;;  %v2664_v36 = vsel %vm2242_vm14, %v1691_v40, %v2453_v0  ;;  %v2662_v46 = vsel %vm2240_vm15, %v1683_v9, %v2451_v5  ;;  %v2123_v34 = vadd.f32 %v6097_v60, %v6164_v3 }
 0x1dc   : > { %3824 = vst.msk [vmem:[%s5272_s29 + $0x324] sm:$0xf] %vm3622_vm1, %v4527_v24  ;;  %v2115_v33 = vadd.f32 %v6097_v60, %v6170_v1  ;;  %v4424_v52 = vpack.c.bf16 %v2664_v36, %v2664_v36  ;;  %v4422_v13 = vpack.c.bf16 %v2662_v46, %v2662_v46  ;;  %v2665_v48 = vsel %vm2243_vm0, %v1694_v41, %v2454_v4 }
 0x1dd   : > { %v2663_v49 = vsel %vm2241_vm2, %v1686_v47, %v2452_v35  ;;  %v4425_v43 = vpack.c.bf16 %v2665_v48, %v2665_v48  ;;  %vm2350_vm3 = vcmp.ge.f32.partialorder %v2123_v34, 0.0  ;;  %v2561_v62 = vmul.f32 0.2, %v2123_v34 }
 0x1de   : > { %v4423_v22 = vpack.c.bf16 %v2663_v49, %v2663_v49  ;;  %3721 = vst.msk [vmem:[%s5272_s29 + $0x188] sm:$0xf] %vm3622_vm1, %v4424_v52  ;;  %3719 = vst.msk [vmem:[%s5272_s29 + $0x180] sm:$0xf] %vm3622_vm1, %v4422_v13  ;;  %vm2348_vm4 = vcmp.ge.f32.partialorder %v2115_v33, 0.0  ;;  %v2126_v3 = vadd.f32 %v6097_v60, %v6178_v25  ;;  %v2118_v1 = vadd.f32 %v6097_v60, %v6184_v55 }
 0x1df   : > { %v2559_v54 = vmul.f32 0.2, %v2115_v33  ;;  %3722 = vst.msk [vmem:[%s5272_s29 + $0x18c] sm:$0xf] %vm3622_vm1, %v4425_v43  ;;  %v2772_v23 = vsel %vm2350_vm3, %v2123_v34, %v2561_v62  ;;  %v1707_v2 = vadd.f32 %v6097_v60, %v6198_v39  ;;  %v1699_v45 = vadd.f32 %v6097_v60, %v6204_v14 }
 0x1e0   : > { %3720 = vst.msk [vmem:[%s5272_s29 + $0x184] sm:$0xf] %vm3622_vm1, %v4423_v22  ;;  %v1710_v29 = vadd.f32 %v6097_v60, %v6214_v50  ;;  %v4532_v25 = vpack.c.bf16 %v2772_v23, %v2772_v23  ;;  %vm2351_vm5 = vcmp.ge.f32.partialorder %v2126_v3, 0.0  ;;  %v2562_v10 = vmul.f32 0.2, %v2126_v3 }
 0x1e1   : > { %v2770_v51 = vsel %vm2348_vm4, %v2115_v33, %v2559_v54  ;;  %vm2349_vm6 = vcmp.ge.f32.partialorder %v2118_v1, 0.0  ;;  %v2560_v59 = vmul.f32 0.2, %v2118_v1  ;;  %vm2246_vm7 = vcmp.ge.f32.partialorder %v1707_v2, 0.0 }
 0x1e2   : > { %v4530_v55 = vpack.c.bf16 %v2770_v51, %v2770_v51  ;;  %3829 = vst.msk [vmem:[%s5272_s29 + $0x338] sm:$0xf] %vm3622_vm1, %v4532_v25  ;;  %v2773_v53 = vsel %vm2351_vm5, %v2126_v3, %v2562_v10  ;;  %v2457_v39 = vmul.f32 0.2, %v1707_v2  ;;  %vm2244_vm8 = vcmp.ge.f32.partialorder %v1699_v45, 0.0 }
 0x1e3   : > { %v2455_v28 = vmul.f32 0.2, %v1699_v45  ;;  %v4533_v14 = vpack.c.bf16 %v2773_v53, %v2773_v53  ;;  %v2771_v50 = vsel %vm2349_vm6, %v2118_v1, %v2560_v59  ;;  %vm2247_vm9 = vcmp.ge.f32.partialorder %v1710_v29, 0.0 }
 0x1e4   : > { %3827 = vst.msk [vmem:[%s5272_s29 + $0x330] sm:$0xf] %vm3622_vm1, %v4530_v55  ;;  %v2458_v7 = vmul.f32 0.2, %v1710_v29  ;;  %v4531_v26 = vpack.c.bf16 %v2771_v50, %v2771_v50  ;;  %v2668_v12 = vsel %vm2246_vm7, %v1707_v2, %v2457_v39  ;;  %v1702_v56 = vadd.f32 %v6097_v60, %v6222_v61 }
 0x1e5   : > { %v2666_v37 = vsel %vm2244_vm8, %v1699_v45, %v2455_v28  ;;  %3830 = vst.msk [vmem:[%s5272_s29 + $0x33c] sm:$0xf] %vm3622_vm1, %v4533_v14  ;;  %v4428_v20 = vpack.c.bf16 %v2668_v12, %v2668_v12  ;;  %v2139_v21 = vadd.f32 %v6097_v60, %v6200_v44  ;;  %v2131_v17 = vadd.f32 %v6097_v60, %v6206_v63 }
 0x1e6   : > { %v4426_v32 = vpack.c.bf16 %v2666_v37, %v2666_v37  ;;  %v2669_v11 = vsel %vm2247_vm9, %v1710_v29, %v2458_v7  ;;  %3828 = vst.msk [vmem:[%s5272_s29 + $0x334] sm:$0xf] %vm3622_vm1, %v4531_v26  ;;  %vm2245_vm10 = vcmp.ge.f32.partialorder %v1702_v56, 0.0  ;;  %v2456_v19 = vmul.f32 0.2, %v1702_v56 }
 0x1e7   : > { %v4429_v16 = vpack.c.bf16 %v2669_v11, %v2669_v11  ;;  %3725 = vst.msk [vmem:[%s5272_s29 + $0x198] sm:$0xf] %vm3622_vm1, %v4428_v20  ;;  %vm2354_vm11 = vcmp.ge.f32.partialorder %v2139_v21, 0.0  ;;  %v2565_v61 = vmul.f32 0.2, %v2139_v21  ;;  %v2134_v27 = vadd.f32 %v6097_v60, %v6224_v8 }
 0x1e8   : > { %3723 = vst.msk [vmem:[%s5272_s29 + $0x190] sm:$0xf] %vm3622_vm1, %v4426_v32  ;;  %v1723_v44 = vadd.f32 %v6097_v60, %v6238_v58  ;;  %v2667_v40 = vsel %vm2245_vm10, %v1702_v56, %v2456_v19  ;;  %vm2352_vm12 = vcmp.ge.f32.partialorder %v2131_v17, 0.0  ;;  %v2563_v9 = vmul.f32 0.2, %v2131_v17 }
 0x1e9   : > { %3726 = vst.msk [vmem:[%s5272_s29 + $0x19c] sm:$0xf] %vm3622_vm1, %v4429_v16  ;;  %v1715_v63 = vadd.f32 %v6097_v60, %v6242_v18  ;;  %v4427_v31 = vpack.c.bf16 %v2667_v40, %v2667_v40  ;;  %v2776_v57 = vsel %vm2354_vm11, %v2139_v21, %v2565_v61  ;;  %vm2353_vm13 = vcmp.ge.f32.partialorder %v2134_v27, 0.0 }
 0x1ea   : > { %v2564_v41 = vmul.f32 0.2, %v2134_v27  ;;  %v4536_v47 = vpack.c.bf16 %v2776_v57, %v2776_v57  ;;  %v2774_v15 = vsel %vm2352_vm12, %v2131_v17, %v2563_v9  ;;  %vm2250_vm14 = vcmp.ge.f32.partialorder %v1723_v44, 0.0 }
 0x1eb   : > { %v2461_v8 = vmul.f32 0.2, %v1723_v44  ;;  %3724 = vst.msk [vmem:[%s5272_s29 + $0x194] sm:$0xf] %vm3622_vm1, %v4427_v31  ;;  %v4534_v58 = vpack.c.bf16 %v2774_v15, %v2774_v15  ;;  %vm2248_vm15 = vcmp.ge.f32.partialorder %v1715_v63, 0.0  ;;  %v1726_v0 = vadd.f32 %v6097_v60, %v6252_v42 }
 0x1ec   : > { %v2775_v38 = vsel %vm2353_vm13, %v2134_v27, %v2564_v41  ;;  %v2459_v6 = vmul.f32 0.2, %v1715_v63  ;;  %3833 = vst.msk [vmem:[%s5272_s29 + $0x348] sm:$0xf] %vm3622_vm1, %v4536_v47  ;;  %v1718_v5 = vadd.f32 %v6097_v60, %v6261_v30 }
 0x1ed   : > { %v4535_v18 = vpack.c.bf16 %v2775_v38, %v2775_v38  ;;  %v2672_v24 = vsel %vm2250_vm14, %v1723_v44, %v2461_v8  ;;  %3831 = vst.msk [vmem:[%s5272_s29 + $0x340] sm:$0xf] %vm3622_vm1, %v4534_v58  ;;  %vm2251_vm0 = vcmp.ge.f32.partialorder %v1726_v0, 0.0  ;;  %v2462_v46 = vmul.f32 0.2, %v1726_v0 }
 0x1ee   : > { %v4432_v4 = vpack.c.bf16 %v2672_v24, %v2672_v24  ;;  %v2670_v35 = vsel %vm2248_vm15, %v1715_v63, %v2459_v6  ;;  %vm2249_vm2 = vcmp.ge.f32.partialorder %v1718_v5, 0.0  ;;  %v2460_v34 = vmul.f32 0.2, %v1718_v5 }
 0x1ef   : > { %3832 = vst.msk [vmem:[%s5272_s29 + $0x344] sm:$0xf] %vm3622_vm1, %v4535_v18  ;;  %v4430_v36 = vpack.c.bf16 %v2670_v35, %v2670_v35  ;;  %v2673_v42 = vsel %vm2251_vm0, %v1726_v0, %v2462_v46 }
 0x1f0   : > { %3729 = vst.msk [vmem:[%s5272_s29 + $0x1a8] sm:$0xf] %vm3622_vm1, %v4432_v4  ;;  %v4433_v33 = vpack.c.bf16 %v2673_v42, %v2673_v42  ;;  %v2671_v60 = vsel %vm2249_vm2, %v1718_v5, %v2460_v34 }
 0x1f1   : > { %3727 = vst.msk [vmem:[%s5272_s29 + $0x1a0] sm:$0xf] %vm3622_vm1, %v4430_v36  ;;  %v4431_v30 = vpack.c.bf16 %v2671_v60, %v2671_v60 }
 0x1f2   : > { %3730 = vst.msk [vmem:[%s5272_s29 + $0x1ac] sm:$0xf] %vm3622_vm1, %v4433_v33 }
 0x1f3   : > { %3728 = vst.msk [vmem:[%s5272_s29 + $0x1a4] sm:$0xf] %vm3622_vm1, %v4431_v30 }
 0x1f4 PF: > { %s13_s12 = sadd.s32 1, %s4995_s12  }
 0x1f5   : > { %p10_p4 = scmp.ge.s32.totalorder %s13_s12, 4  }
 0x1f7   :  { %12 = sbr.rel (!%p10_p4) target bundleno = 1 (0x1), region = 62 }

</bundles_post_ra>
